<compile_context>
chip_gen: v7x
topology: tpu7x:2x2x1
jax: 0.10.0
libtpu: 0.0.40
codegen_flags: <defaults>
</compile_context>

<pallas_src>
import functools

import jax
import jax.numpy as jnp
from jax import lax
from jax.experimental import pallas as pl
from jax.experimental.pallas import tpu as pltpu


def self_attention_kernel(x_ref, gg_ref, c_ref, wh_ref, bh_ref, gamma_ref,
                          o_ref, *, tq):
    """Grid = (B, HW // tq). One query-row tile of size `tq` per inner step.

    x_ref  : (C, HW)  f32 input block, resident across the tile axis
    gg_ref : (C, HW)  bf16, precomputed (Wf^T Wg) @ x
    c_ref  : (1, HW)  f32, precomputed key-side bias row (Wg^T bf) . x_j
    wh_ref : (C, C)   bf16 weights of the 'h' 1x1 conv
    bh_ref : (C, 1)   f32 bias of the 'h' 1x1 conv
    gamma_ref : (1, 1) scalar in SMEM
    o_ref  : (C, HW)  f32 output block, resident; doubles as the accumulator
    """
    t = pl.program_id(1)

    @pl.when(t == 0)
    def _init():
        o_ref[...] = jnp.zeros_like(o_ref)

    # Query-row tile of the spatial axis (bf16 operands for all matmuls).
    col0 = pl.multiple_of(t * tq, tq)
    x_t = x_ref[:, pl.ds(col0, tq)].astype(jnp.bfloat16)          # (C, tq)

    # h projection for this tile: bf16 operands, f32 accumulation.
    h_t = (jnp.dot(wh_ref[...], x_t, preferred_element_type=jnp.float32)
           + bh_ref[...])                                          # (C, tq) f32

    # Attention scores: att[i, j] = x_i^T (M x_j) + c_j.  Contract the C axis
    # of x_t and gg directly (no XLU transpose), bf16 operands / f32 acc.
    att = lax.dot_general(x_t, gg_ref[...],
                          dimension_numbers=(((0,), (0,)), ((), ())),
                          preferred_element_type=jnp.float32)      # (tq, HW)
    att = att + c_ref[...]                                         # (1, HW) bcast

    # Row softmax over the last axis (matches nn.Softmax(dim=2)); f32 stats,
    # fused epilogue with an EUP approximate reciprocal, single bf16 cast.
    att = att - jnp.max(att, axis=-1, keepdims=True)
    e = jnp.exp(att)
    p = (e * pl.reciprocal(jnp.sum(e, axis=-1, keepdims=True), approx=True)
         ).astype(jnp.bfloat16)                                    # (tq, HW)

    # acc[:, j] += sum_{i in tile} h[:, i] * p[i, j]
    o_ref[...] += jnp.dot(h_t.astype(jnp.bfloat16), p,
                          preferred_element_type=jnp.float32)

    @pl.when(t == pl.num_programs(1) - 1)
    def _finalize():
        o_ref[...] = gamma_ref[0, 0] * o_ref[...] + x_ref[...]


def _pick_query_tile(hw, c, max_tile=None, vmem_budget_bytes=48 * 1024 * 1024):
    """Largest multiple-of-128 query tile dividing HW that fits the budget."""
    if hw % 128 != 0:
        # TODO(synk): pad HW to a lane multiple + mask instead of one big tile.
        return hw
    # Rough per-batch VMEM estimate: double-buffered resident x/o/gg/c blocks
    # plus ~3 f32 + 1 bf16 live (Tq, HW) softmax temps per grid step.
    resident = 2 * (c * hw * (4 + 4 + 2) + hw * 4)
    per_row = hw * (3 * 4 + 2)
    cap = (max(vmem_budget_bytes - resident, 0) // per_row) // 128 * 128
    cap = min(hw, max(cap, 128))
    if max_tile is not None:
        cap = min(cap, max(128, (max_tile // 128) * 128))
    for t in range(cap, 127, -128):
        if hw % t == 0:
            return t
    return hw


def self_attention_pallas(x_nchw, wf, bf, wg, bg, wh, bh, gamma,
                          *, max_query_tile=None):
    B, C, H, W = x_nchw.shape
    HW = H * W
    Tq = _pick_query_tile(HW, C, max_query_tile)
    n_tiles = HW // Tq if HW % Tq == 0 else 1
    if HW % Tq != 0:
        Tq = HW

    x_flat = x_nchw.reshape(B, C, HW).astype(jnp.float32)

    # Fold the f/g 1x1 convs: M = Wf^T Wg; the row-constant bias terms cancel
    # under the row softmax, the key-side term (Wg^T bf) . x_j is kept.
    hi = jax.lax.Precision.HIGHEST
    M = jnp.dot(wf.T, wg, precision=hi).astype(jnp.float32)          # (C, C)
    gg = jnp.einsum('cd,bdh->bch', M, x_flat,
                    precision=hi).astype(jnp.bfloat16)               # (B, C, HW)
    c_vec = jnp.dot(wg.T, bf, precision=hi)                          # (C,)
    c_row = jnp.einsum('c,bch->bh', c_vec, x_flat,
                       precision=hi).reshape(B, 1, HW)               # (B, 1, HW)

    wh_bf = wh.astype(jnp.bfloat16)                                  # (C, C)
    bh2 = bh.reshape(C, 1).astype(jnp.float32)
    gamma2 = jnp.asarray(gamma, jnp.float32).reshape(1, 1)

    # Advisory cost estimate for the XLA scheduler (kernel-side work only).
    flops = B * (2 * C * C * HW            # h projection
                 + 4 * C * HW * HW         # QK + PV matmuls
                 + 5 * HW * HW             # softmax elementwise
                 + 3 * C * HW)             # finalize
    transcendentals = B * HW * HW          # exp
    bytes_accessed = (B * C * HW * (4 + 4 + 2)      # x read, out write, gg read
                      + B * HW * 4                  # c_row
                      + C * C * 2 + C * 4 + 4)      # Wh, bh, gamma

    kernel = functools.partial(self_attention_kernel, tq=Tq)

    out_flat = pl.pallas_call(
        kernel,
        out_shape=jax.ShapeDtypeStruct((B, C, HW), jnp.float32),
        grid_spec=pltpu.PrefetchScalarGridSpec(
            num_scalar_prefetch=0,
            grid=(B, n_tiles),
            in_specs=[
                pl.BlockSpec((None, C, HW), lambda b, t: (b, 0, 0)),  # x
                pl.BlockSpec((None, C, HW), lambda b, t: (b, 0, 0)),  # gg
                pl.BlockSpec((None, 1, HW), lambda b, t: (b, 0, 0)),  # c_row
                pl.BlockSpec((C, C), lambda b, t: (0, 0)),            # Wh (bf16)
                pl.BlockSpec((C, 1), lambda b, t: (0, 0)),            # bh
                pl.BlockSpec(memory_space=pltpu.SMEM),                # gamma
            ],
            out_specs=pl.BlockSpec((None, C, HW), lambda b, t: (b, 0, 0)),
        ),
        compiler_params=pltpu.CompilerParams(
            dimension_semantics=("parallel", "arbitrary"),
            vmem_limit_bytes=48 * 1024 * 1024),
        cost_estimate=pl.CostEstimate(flops=flops,
                                      transcendentals=transcendentals,
                                      bytes_accessed=bytes_accessed),
    )(x_flat, gg, c_row, wh_bf, bh2, gamma2)

    return out_flat.reshape(B, C, H, W)


def self_attention_ref(x, wf, bf, wg, bg, wh, bh, gamma):
    """Pure-JAX reference (mirrors the PyTorch forward)."""
    B, C, H, W = x.shape
    HW = H * W
    xf = x.reshape(B, C, HW)
    f = jnp.einsum('oc,bch->boh', wf, xf) + bf[None, :, None]   # (B, C8, HW)
    g = jnp.einsum('oc,bch->boh', wg, xf) + bg[None, :, None]   # (B, C8, HW)
    h = jnp.einsum('oc,bch->boh', wh, xf) + bh[None, :, None]   # (B, C,  HW)
    att = jnp.einsum('bci,bcj->bij', f, g)                      # (B, HW, HW)
    att = jax.nn.softmax(att, axis=2)
    out = jnp.einsum('bci,bij->bcj', h, att).reshape(B, C, H, W)
    return gamma * out + x


if __name__ == "__main__":
    # in_channels must be >= 8 (module uses in_channels // 8 projection dims).
    # H = W = 16 -> HW = 256: lane-dense (multiple of 128).
    B, C, H, W = 2, 32, 16, 16
    C8 = C // 8

    key = jax.random.PRNGKey(0)
    kx, kf, kbf, kg, kbg, kh, kbh = jax.random.split(key, 7)

    x = jax.random.normal(kx, (B, C, H, W), dtype=jnp.float32)

    # Deterministic parameter init (shapes from the module's __init__).
    wf = jax.random.normal(kf, (C8, C), dtype=jnp.float32) * 0.1
    bf = jax.random.normal(kbf, (C8,), dtype=jnp.float32) * 0.1
    wg = jax.random.normal(kg, (C8, C), dtype=jnp.float32) * 0.1
    bg = jax.random.normal(kbg, (C8,), dtype=jnp.float32) * 0.1
    wh = jax.random.normal(kh, (C, C), dtype=jnp.float32) * 0.1
    bh = jax.random.normal(kbh, (C,), dtype=jnp.float32) * 0.1
    # nn.Parameter(torch.zeros(1)) in __init__; use a nonzero value so the
    # attention path is actually exercised (value is a free parameter).
    gamma = jnp.array([0.5], dtype=jnp.float32)

    ref = self_attention_ref(x, wf, bf, wg, bg, wh, bh, gamma)

    # Default tiling (Tq = HW = 256 here -> single tile per batch element).
    out = self_attention_pallas(x, wf, bf, wg, bg, wh, bh, gamma)
    out = jax.block_until_ready(out)
    assert out.shape == (B, C, H, W)
    # bf16 MXU operands + approx reciprocal => relaxed tolerance (f32 softmax
    # stats and f32 accumulation keep the error well inside 2e-2).
    assert jnp.allclose(out, ref, rtol=2e-2, atol=2e-2), "mismatch vs reference"

    # Also exercise the multi-tile accumulation path (two query tiles of 128).
    out_tiled = self_attention_pallas(x, wf, bf, wg, bg, wh, bh, gamma,
                                      max_query_tile=128)
    out_tiled = jax.block_until_ready(out_tiled)
    assert jnp.allclose(out_tiled, ref, rtol=2e-2, atol=2e-2), \
        "mismatch vs reference (tiled path)"

    print("KERNEL_OK")
</pallas_src>

<mosaic_0001>
module attributes {stable_mosaic.version = 11 : i64} {
  func.func @self_attention_kernel(%arg0: i32, %arg1: i32, %arg2: memref<1x32x256xf32, #tpu.memory_space<vmem>>, %arg3: memref<1x32x256xbf16, #tpu.memory_space<vmem>>, %arg4: memref<1x1x256xf32, #tpu.memory_space<vmem>>, %arg5: memref<32x32xbf16, #tpu.memory_space<vmem>>, %arg6: memref<32x1xf32, #tpu.memory_space<vmem>>, %arg7: memref<1x1xf32, #tpu.memory_space<smem>>, %arg8: memref<1x32x256xf32, #tpu.memory_space<vmem>>) attributes {dimension_semantics = [#tpu.dimension_semantics<parallel>, #tpu.dimension_semantics<arbitrary>], iteration_bounds = array<i64: 2, 1>, scalar_prefetch = 0 : i64, scratch_operands = 0 : i64, tpu.core_type = #tpu.core_type<tc>, window_params = [{transform_indices = @transform_0, window_bounds = array<i64: 1, 32, 256>}, {transform_indices = @transform_1, window_bounds = array<i64: 1, 32, 256>}, {transform_indices = @transform_2, window_bounds = array<i64: 1, 1, 256>}, {pipeline_mode = #tpu.pipeline_mode<synchronous>, transform_indices = @transform_3, window_bounds = array<i64: 32, 32>}, {pipeline_mode = #tpu.pipeline_mode<synchronous>, transform_indices = @transform_4, window_bounds = array<i64: 32, 1>}, {transform_indices = @transform_5, window_bounds = array<i64: 1, 1>}, {transform_indices = @transform_6, window_bounds = array<i64: 1, 32, 256>}]} {
    %c0_i32 = arith.constant 0 : i32
    %0 = arith.cmpi eq, %arg1, %c0_i32 : i32
    %1 = arith.extui %0 : i1 to i32
    %c0_i32_0 = arith.constant 0 : i32
    %2 = arith.cmpi ne, %1, %c0_i32_0 : i32
    scf.if %2 {
      %cst_24 = arith.constant 0.000000e+00 : f32
      %43 = vector.broadcast %cst_24 : f32 to vector<32x256xf32>
      %c0_25 = arith.constant 0 : index
      %c0_26 = arith.constant 0 : index
      %c0_27 = arith.constant 0 : index
      %44 = vector.load %arg8[%c0_25, %c0_26, %c0_27] : memref<1x32x256xf32, #tpu.memory_space<vmem>>, vector<1x32x256xf32>
      %45 = vector.shape_cast %44 : vector<1x32x256xf32> to vector<32x256xf32>
      %46 = vector.shape_cast %43 : vector<32x256xf32> to vector<1x32x256xf32>
      tpu.vector_store %arg8[%c0_25, %c0_26, %c0_27], %46 {strides = array<i32>} : memref<1x32x256xf32, #tpu.memory_space<vmem>>, vector<1x32x256xf32>,
    } else {
    }
    %c256_i32 = arith.constant 256 : i32
    %3 = arith.muli %arg1, %c256_i32 : i32
    %4 = tpu.assume_multiple %3, 256 : i32
    %c0 = arith.constant 0 : index
    %c0_1 = arith.constant 0 : index
    %5 = arith.index_cast %4 : i32 to index
    %6 = vector.load %arg2[%c0, %c0_1, %5] : memref<1x32x256xf32, #tpu.memory_space<vmem>>, vector<1x32x256xf32>
    %7 = vector.shape_cast %6 : vector<1x32x256xf32> to vector<32x256xf32>
    %8 = arith.truncf %7 : vector<32x256xf32> to vector<32x256xbf16>
    %c0_2 = arith.constant 0 : index
    %c0_3 = arith.constant 0 : index
    %9 = vector.load %arg5[%c0_2, %c0_3] : memref<32x32xbf16, #tpu.memory_space<vmem>>, vector<32x32xbf16>
    %cst = arith.constant dense<0.000000e+00> : vector<32x256xf32>
    %10 = tpu.matmul %9, %8, %cst {dimension_numbers = #tpu.dot_dimension_numbers<[1], [0], [0], [1], [0, 0, 1, 1], [], []>} : vector<32x32xbf16>, vector<32x256xbf16>, vector<32x256xf32> -> vector<32x256xf32>
    %c0_4 = arith.constant 0 : index
    %c0_5 = arith.constant 0 : index
    %11 = vector.load %arg6[%c0_4, %c0_5] : memref<32x1xf32, #tpu.memory_space<vmem>>, vector<32x1xf32>
    %12 = vector.broadcast %11 : vector<32x1xf32> to vector<32x256xf32>
    %13 = arith.addf %10, %12 : vector<32x256xf32>
    %c0_6 = arith.constant 0 : index
    %c0_7 = arith.constant 0 : index
    %c0_8 = arith.constant 0 : index
    %14 = vector.load %arg3[%c0_6, %c0_7, %c0_8] : memref<1x32x256xbf16, #tpu.memory_space<vmem>>, vector<1x32x256xbf16>
    %15 = vector.shape_cast %14 : vector<1x32x256xbf16> to vector<32x256xbf16>
    %cst_9 = arith.constant dense<0.000000e+00> : vector<256x256xf32>
    %16 = tpu.matmul %8, %15, %cst_9 {dimension_numbers = #tpu.dot_dimension_numbers<[0], [0], [1], [1], [0, 1, 1, 1], [], []>} : vector<32x256xbf16>, vector<32x256xbf16>, vector<256x256xf32> -> vector<256x256xf32>
    %c0_10 = arith.constant 0 : index
    %c0_11 = arith.constant 0 : index
    %c0_12 = arith.constant 0 : index
    %17 = vector.load %arg4[%c0_10, %c0_11, %c0_12] : memref<1x1x256xf32, #tpu.memory_space<vmem>>, vector<1x1x256xf32>
    %18 = vector.shape_cast %17 : vector<1x1x256xf32> to vector<1x256xf32>
    %19 = vector.broadcast %18 : vector<1x256xf32> to vector<256x256xf32>
    %20 = arith.addf %16, %19 : vector<256x256xf32>
    %cst_13 = arith.constant dense<0xFF800000> : vector<256xf32>
    %21 = vector.multi_reduction <maximumf>, %20, %cst_13 [1] : vector<256x256xf32> to vector<256xf32>
    %22 = vector.shape_cast %21 : vector<256xf32> to vector<256x1xf32>
    %23 = vector.broadcast %22 : vector<256x1xf32> to vector<256x256xf32>
    %24 = arith.subf %20, %23 : vector<256x256xf32>
    %25 = math.exp %24 : vector<256x256xf32>
    %cst_14 = arith.constant dense<0.000000e+00> : vector<256xf32>
    %26 = vector.multi_reduction <add>, %25, %cst_14 [1] : vector<256x256xf32> to vector<256xf32>
    %27 = vector.shape_cast %26 : vector<256xf32> to vector<256x1xf32>
    %28 = tpu.reciprocal %27 {approx = true} : vector<256x1xf32> -> vector<256x1xf32>
    %29 = vector.broadcast %28 : vector<256x1xf32> to vector<256x256xf32>
    %30 = arith.mulf %25, %29 : vector<256x256xf32>
    %31 = arith.truncf %30 : vector<256x256xf32> to vector<256x256xbf16>
    %c0_15 = arith.constant 0 : index
    %c0_16 = arith.constant 0 : index
    %c0_17 = arith.constant 0 : index
    %32 = vector.load %arg8[%c0_15, %c0_16, %c0_17] : memref<1x32x256xf32, #tpu.memory_space<vmem>>, vector<1x32x256xf32>
    %33 = vector.shape_cast %32 : vector<1x32x256xf32> to vector<32x256xf32>
    %34 = arith.truncf %13 : vector<32x256xf32> to vector<32x256xbf16>
    %cst_18 = arith.constant dense<0.000000e+00> : vector<32x256xf32>
    %35 = tpu.matmul %34, %31, %cst_18 {dimension_numbers = #tpu.dot_dimension_numbers<[1], [0], [0], [1], [0, 0, 1, 1], [], []>} : vector<32x256xbf16>, vector<256x256xbf16>, vector<32x256xf32> -> vector<32x256xf32>
    %36 = arith.addf %33, %35 : vector<32x256xf32>
    %c0_19 = arith.constant 0 : index
    %c0_20 = arith.constant 0 : index
    %c0_21 = arith.constant 0 : index
    %37 = vector.load %arg8[%c0_19, %c0_20, %c0_21] : memref<1x32x256xf32, #tpu.memory_space<vmem>>, vector<1x32x256xf32>
    %38 = vector.shape_cast %37 : vector<1x32x256xf32> to vector<32x256xf32>
    %39 = vector.shape_cast %36 : vector<32x256xf32> to vector<1x32x256xf32>
    tpu.vector_store %arg8[%c0_19, %c0_20, %c0_21], %39 {strides = array<i32>} : memref<1x32x256xf32, #tpu.memory_space<vmem>>, vector<1x32x256xf32>,
    %c0_i32_22 = arith.constant 0 : i32
    %40 = arith.cmpi eq, %arg1, %c0_i32_22 : i32
    %41 = arith.extui %40 : i1 to i32
    %c0_i32_23 = arith.constant 0 : i32
    %42 = arith.cmpi ne, %41, %c0_i32_23 : i32
    scf.if %42 {
      %c0_24 = arith.constant 0 : index
      %c0_25 = arith.constant 0 : index
      %43 = memref.load %arg7[%c0_24, %c0_25] : memref<1x1xf32, #tpu.memory_space<smem>>
      %c0_26 = arith.constant 0 : index
      %c0_27 = arith.constant 0 : index
      %c0_28 = arith.constant 0 : index
      %44 = vector.load %arg8[%c0_26, %c0_27, %c0_28] : memref<1x32x256xf32, #tpu.memory_space<vmem>>, vector<1x32x256xf32>
      %45 = vector.shape_cast %44 : vector<1x32x256xf32> to vector<32x256xf32>
      %46 = vector.broadcast %43 : f32 to vector<32x256xf32>
      %47 = arith.mulf %46, %45 : vector<32x256xf32>
      %c0_29 = arith.constant 0 : index
      %c0_30 = arith.constant 0 : index
      %c0_31 = arith.constant 0 : index
      %48 = vector.load %arg2[%c0_29, %c0_30, %c0_31] : memref<1x32x256xf32, #tpu.memory_space<vmem>>, vector<1x32x256xf32>
      %49 = vector.shape_cast %48 : vector<1x32x256xf32> to vector<32x256xf32>
      %50 = arith.addf %47, %49 : vector<32x256xf32>
      %c0_32 = arith.constant 0 : index
      %c0_33 = arith.constant 0 : index
      %c0_34 = arith.constant 0 : index
      %51 = vector.load %arg8[%c0_32, %c0_33, %c0_34] : memref<1x32x256xf32, #tpu.memory_space<vmem>>, vector<1x32x256xf32>
      %52 = vector.shape_cast %51 : vector<1x32x256xf32> to vector<32x256xf32>
      %53 = vector.shape_cast %50 : vector<32x256xf32> to vector<1x32x256xf32>
      tpu.vector_store %arg8[%c0_32, %c0_33, %c0_34], %53 {strides = array<i32>} : memref<1x32x256xf32, #tpu.memory_space<vmem>>, vector<1x32x256xf32>,
    } else {
    }
    return
  }
  func.func @transform_0(%arg0: i32, %arg1: i32) -> (i32, i32, i32) {
    %c0_i32 = arith.constant 0 : i32
    %c0_i32_0 = arith.constant 0 : i32
    %c0_i32_1 = arith.constant 0 : i32
    return %arg0, %c0_i32, %c0_i32_0 : i32, i32, i32
  }
  func.func @transform_1(%arg0: i32, %arg1: i32) -> (i32, i32, i32) {
    %c0_i32 = arith.constant 0 : i32
    %c0_i32_0 = arith.constant 0 : i32
    %c0_i32_1 = arith.constant 0 : i32
    return %arg0, %c0_i32, %c0_i32_0 : i32, i32, i32
  }
  func.func @transform_2(%arg0: i32, %arg1: i32) -> (i32, i32, i32) {
    %c0_i32 = arith.constant 0 : i32
    %c0_i32_0 = arith.constant 0 : i32
    %c0_i32_1 = arith.constant 0 : i32
    return %arg0, %c0_i32, %c0_i32_0 : i32, i32, i32
  }
  func.func @transform_3(%arg0: i32, %arg1: i32) -> (i32, i32) {
    %c0_i32 = arith.constant 0 : i32
    %c0_i32_0 = arith.constant 0 : i32
    %c0_i32_1 = arith.constant 0 : i32
    return %c0_i32, %c0_i32_0 : i32, i32
  }
  func.func @transform_4(%arg0: i32, %arg1: i32) -> (i32, i32) {
    %c0_i32 = arith.constant 0 : i32
    %c0_i32_0 = arith.constant 0 : i32
    %c0_i32_1 = arith.constant 0 : i32
    return %c0_i32, %c0_i32_0 : i32, i32
  }
  func.func @transform_5(%arg0: i32, %arg1: i32) -> (i32, i32) {
    %c0_i32 = arith.constant 0 : i32
    %c0_i32_0 = arith.constant 0 : i32
    %c0_i32_1 = arith.constant 0 : i32
    return %c0_i32, %c0_i32_0 : i32, i32
  }
  func.func @transform_6(%arg0: i32, %arg1: i32) -> (i32, i32, i32) {
    %c0_i32 = arith.constant 0 : i32
    %c0_i32_0 = arith.constant 0 : i32
    %c0_i32_1 = arith.constant 0 : i32
    return %arg0, %c0_i32, %c0_i32_0 : i32, i32, i32
  }
}

</mosaic_0001>

<bundles_post_ra>
// kernel: tpu_custom_call.1
= control target key start
LH: loop header
LB: loop body
LE: loop exit
PB: predicated region body
PF: predicated region fallthrough
CT: control target
= control target key end

     0   :  { %s2979_s0 = inlined_call_operand.hbm [shape: f32[2,32,256], index: 0, kind: input, shape index: {}]   ;;  %s2980_s1 = inlined_call_operand.hbm [shape: bf16[2,32,256], index: 1, kind: input, shape index: {}]   ;;  %s2981_s2 = inlined_call_operand.vmem [shape: f32[2,1,256], index: 2, kind: input, shape index: {}]   ;;  %s2982_s3 = inlined_call_operand.vmem [shape: bf16[32,32], index: 3, kind: input, shape index: {}]   ;;  %s2983_s4 = inlined_call_operand.vmem [shape: f32[32,1], index: 4, kind: input, shape index: {}]   ;;  %s2984_s5 = inlined_call_operand.<no memory space> [shape: f32[1,1], index: 5, kind: input, shape index: {}]   ;;  %s2985_s6 = inlined_call_operand.hbm [shape: f32[2,32,256], index: 6, kind: output, shape index: {}]  }
   0x1   :  { %3014 = sst [smem:[#allocation32_spill]] %s2979_s0 }
   0x2   :  { %11 = sst [smem:[#allocation2]] %s2984_s5 }
   0x3   :  { %12 = vsyncpa [#allocation4], 0 }
   0x4   :  { %14 = vsyncpa [#allocation4 + $0x1], 0 }
   0x5   :  { %15 = vsyncpa [#allocation7], 0 }
   0x6   :  { %17 = vsyncpa [#allocation7 + $0x1], 0 }
   0x7   :  { %18 = vsyncpa [#allocation5], 0 }
   0x8   :  { %20 = vsyncpa [#allocation5 + $0x1], 0  ;;  %s2067_s23 = smov 0   ;;  %s2069_s24 = smov 0  }
   0x9   :  { %s2071_s25 = smov 0   ;;  %s2073_s26 = smov 0  }
   0xa   :  { %s2075_s27 = smov 0   ;;  %s2077_s28 = smov 0  }
   0xb LB: > { %s1547_s5 = sadd.s32 4294967295, %s2017_s28   ;;  %s1548_s29 = sadd.s32 4294967294, %s2017_s28   ;;  %s2017_s28 = sphi %s2077_s28, %s26_s28   ;;  %s2013_s27 = sphi %s2075_s27, %s3095_s27   ;;  %s2009_s26 = sphi %s2073_s26, %s3094_s26   ;;  %s2005_s25 = sphi %s2071_s25, %s3093_s25   ;;  %s2001_s24 = sphi %s2069_s24, %s3092_s24   ;;  %s1997_s23 = sphi %s2067_s23, %s3091_s23  }
   0xc   : > { %s38_s30 = sadd.s32 1, %s2013_s27  ;;  %s45_s7 = sadd.s32 1, %s2005_s25 }
   0xd   : > { %p40_p0 = scmp.ge.s32.totalorder %s38_s30, 2  ;;  %p52_p1 = scmp.ne.s32.totalorder %s2005_s25, %s2001_s24 }
   0xe   : > { %p53_p2 = scmp.eq.s32.totalorder %s2017_s28, 0  ;;  %p58_p3 = scmp.ne.s32.totalorder %s2001_s24, %s1997_s23 }
   0xf   : > { %s3097_s30 = smov (%p40_p0, %s38_s30), 0  ;;  %p59_p5 = scmp.eq.s32.totalorder %s1547_s5, 0 }
  0x10   : > { %p2108_p4 = por %p53_p2, %p52_p1  ;;  %s42_s9 = ssub.s32 %s2013_s27, %s3097_s30 }
  0x11   : > { %p197_p6 = scmp.eq.s32.totalorder %s1547_s5, 1  ;;  %p43_p7 = scmp.eq.s32.totalorder %s42_s9, 0 }
  0x12   : > { %p2114_p8 = por %p59_p5, %p58_p3  ;;  %p203_p10 = scmp.eq.s32.totalorder %s1548_s29, 1 }
  0x13   : > { %p2118_p9 = por %p197_p6, %p52_p1  ;;  %p1611_p13 = scmp.lt.s32.totalorder %s2017_s28, 2 }
  0x14   : > { %s3016_s10 = scalar_select %p2114_p8, 1, 0 }
  0x15   : > { %s3017_s11 = scalar_select %p2118_p9, 1, 0 }
  0x16   : > { %s2123_s12 = scalar_select %p43_p7, %s2005_s25, %s45_s7  }
  0x17   : > { %p2125_p11 = por %p203_p10, %p58_p3  ;;  %s2132_s14 = sand.u32 1, %s2005_s25  }
  0x18   : > { %s1551_s15 = sshll.u32 %s2132_s14, 6  ;;  %s1591_s16 = sshll.u32 %s2013_s27, 10 }
  0x19   : > { %s3018_s13 = scalar_select %p2125_p11, 1, 0 }
  0x1a   : > { %s3019_s0 = sld [smem:[#allocation32_spill]]  ;;  %s236_s20 = scalar_lea.vmem [#allocation3], %s1551_s15 }
  0x1b   : > { %s243_s21 = sshll.u32 %s236_s20, 4  ;;  %p2145_p0 = pnand %p1611_p13, %p2108_p4  ;;  %s2141_s21 = int_to_ptr.vmem [resolvable:$true] %s243_s21 }
  0x1c   : > { %s233_s5 = scalar_lea.sflag [#allocation4], %s2132_s14 }
  0x1d   : > { %p1873_p3 = pneg %p2145_p0 }
  0x20   : > { %s2139_s19 = scalar_lea.hbm %s3019_s0, %s1591_s16  ;;  %s1876_s8 = scalar_lea.hbm %s3019_s0, 2048 }
  0x21   : > { %s1871_s29 = scalar_lea.hbm %s2139_s19, 1024  ;;  %p1877_p4 = scmp.lt.u32.totalorder %s2139_s19, %s3019_s0 }
  0x22   : > { %p1872_p2 = scmp.ne.s32.totalorder %s2139_s19, %s1871_s29  ;;  %p1878_p7 = scmp.lt.u32.totalorder %s1876_s8, %s1871_s29 }
  0x23   : > { %p1880_p13 = scmp.lt.u32.totalorder %s1871_s29, %s2139_s19 }
  0x24   : > { %p1874_p5 = pnand %p1873_p3, %p1872_p2  ;;  %p1879_p10 = por %p1878_p7, %p1877_p4 }
  0x26   : > { %p1875_p6 = pneg %p1874_p5  ;;  %p1881_p12 = por %p1880_p13, %p1879_p10 }
  0x28   : > { %p1882_p1 = pnand %p1881_p12, %p1875_p6 }
  0x2a   : > { %1885 = shalt.err (!%p1882_p1)
}
  0x2b   : > { %s1886_s17 = scalar_lea.vmem %s2141_s21, 1024  ;;  %s2019_s18 = smov [#allocation3]  }
  0x2c   : > { %p1887_p2 = scmp.ne.s32.totalorder %s2141_s21, %s1886_s17  ;;  %s1891_s20 = sshll.u32 %s2019_s18, 4  ;;  %s1892_s20 = int_to_ptr.vmem [resolvable:$false] %s1891_s20 }
  0x2d   : > { %s1893_s7 = scalar_lea.vmem %s1892_s20, 2048  ;;  %p1894_p9 = scmp.lt.s32.totalorder %s2141_s21, %s1892_s20 }
  0x2e   : > { %p1889_p5 = pnand %p1887_p2, %p1873_p3  ;;  %p1895_p4 = scmp.lt.s32.totalorder %s1893_s7, %s1886_s17 }
  0x30   : > { %p1890_p11 = pneg %p1889_p5  ;;  %p1896_p7 = por %p1895_p4, %p1894_p9 }
  0x32   : > { %p1897_p10 = pnand %p1896_p7, %p1890_p11 }
  0x34   : > { %1900 = shalt.err (!%p1897_p10)
}
  0x35   : > { %s2020_s29 = smov 256   ;;  %s2021_s9 = smov 16  }
  0x36   : > { %1603 = dma.hbm_to_vmem [thread:$0]  (!%p2145_p0), %s2139_s19, 1024, %s2141_s21, %s233_s5, %s2020_s29, %s2020_s29, %s2021_s9  }
  0x37   : > { %p279_p12 = scmp.lt.s32.totalorder %s2017_s28, 3  ;;  %s1554_s8 = sshll.u32 %s2132_s14, 5 }
  0x38   : > { %s1592_s15 = sshll.u32 %s2013_s27, 9  ;;  %p3021_p9 = scmp.ge.s32.totalorder %s2017_s28, 1 }
  0x39   : > { %s2190_s20 = scalar_lea.hbm %s2980_s1, %s1592_s15  ;;  %s257_s7 = scalar_lea.vmem [#allocation6], %s1554_s8 }
  0x3a   : > { %p2183_p11 = pnand %p3021_p9, %p279_p12  ;;  %s264_s0 = sshll.u32 %s257_s7, 4  ;;  %s2192_s0 = int_to_ptr.vmem [resolvable:$true] %s264_s0 }
  0x3b   : > { %s254_s19 = scalar_lea.sflag [#allocation7], %s2132_s14  ;;  %s1901_s21 = scalar_lea.hbm %s2190_s20, 512 }
  0x3c   : > { %p1902_p1 = scmp.ne.s32.totalorder %s2190_s20, %s1901_s21  ;;  %s1906_s9 = scalar_lea.hbm %s2980_s1, 1024 }
  0x3d   : > { %p1907_p2 = scmp.lt.u32.totalorder %s2190_s20, %s2980_s1  ;;  %p1908_p5 = scmp.lt.u32.totalorder %s1906_s9, %s1901_s21 }
  0x3e   : > { %p1904_p6 = pnand %p1902_p1, %p1873_p3  ;;  %p1910_p7 = scmp.lt.u32.totalorder %s1901_s21, %s2190_s20 }
  0x3f   : > { %p1909_p4 = por %p1908_p5, %p1907_p2 }
  0x40   : > { %p1905_p13 = pneg %p1904_p6 }
  0x41   : > { %p1911_p10 = por %p1910_p7, %p1909_p4 }
  0x43   : > { %p1912_p12 = pnand %p1911_p10, %p1905_p13 }
  0x45   : > { %1915 = shalt.err (!%p1912_p12)
}
  0x46   : > { %s1916_s8 = scalar_lea.vmem %s2192_s0, 512  ;;  %s2022_s18 = smov [#allocation6]  }
  0x47   : > { %p1917_p9 = scmp.ne.s32.totalorder %s2192_s0, %s1916_s8  ;;  %s1921_s7 = sshll.u32 %s2022_s18, 4  ;;  %s1922_s7 = int_to_ptr.vmem [resolvable:$false] %s1921_s7 }
  0x48   : > { %s1923_s5 = scalar_lea.vmem %s1922_s7, 1024  ;;  %p1924_p8 = scmp.lt.s32.totalorder %s2192_s0, %s1922_s7 }
  0x49   : > { %p1919_p1 = pnand %p1917_p9, %p1873_p3  ;;  %p1925_p2 = scmp.lt.s32.totalorder %s1923_s5, %s1916_s8 }
  0x4b   : > { %p1920_p6 = pneg %p1919_p1  ;;  %p1926_p5 = por %p1925_p2, %p1924_p8 }
  0x4d   : > { %p1927_p4 = pnand %p1926_p5, %p1920_p6 }
  0x4f   : > { %1930 = shalt.err (!%p1927_p4)
}
  0x50   : > { %s2023_s21 = smov 128   ;;  %s2024_s29 = smov 8  }
  0x51   : > { %1606 = dma.hbm_to_vmem [thread:$0]  (!%p2145_p0), %s2190_s20, 512, %s2192_s0, %s254_s19, %s2023_s21, %s2023_s21, %s2024_s29  }
  0x52   : > { %283 = sbr.rel (%p2183_p11) target bundleno = 1153 (0x481), region = 44 }
  0x59   : > { %s2223_s9 = sand.u32 1, %s2001_s24   ;;  %p3023_p8 = scmp.ne.s32.totalorder %s3016_s10, 0 }
  0x5a   : > { %s1558_s15 = sshll.u32 %s2223_s9, 6  ;;  %s286_s17 = scalar_lea.sflag [#allocation4], %s2223_s9 }
  0x5b   : > { %s2229_s8 = scalar_lea.vmem [#allocation3], %s1558_s15 }
  0x5c   : > { %1984 = dma.done.wait (%p3023_p8), %s286_s17, 1024  }
  0x5d   : > { %1986 = vsyncadd (%p3023_p8), %s286_s17, 4294966272  ;;  %s1559_s0 = sshll.u32 %s2223_s9, 5  ;;  %s295_s14 = scalar_lea.sflag [#allocation7], %s2223_s9 }
  0x5e   : > { %s298_s22 = scalar_lea.vmem [#allocation6], %s1559_s0 }
  0x5f   : > { %1988 = dma.done.wait (%p3023_p8), %s295_s14, 512  }
  0x60   : > { %1990 = vsyncadd (%p3023_p8), %s295_s14, 4294966784  ;;  %v2025_v0 = vmov 0   ;;  %v358_v1 = vld [vmem:[%s2229_s8] sm:$0xff]  ;;  %v360_v2 = vld [vmem:[%s2229_s8 + $0x10] sm:$0xff]  ;;  %vm408_vm0 = vcmask 261120   ;;  %p336_p0 = scmp.lt.s32.totalorder %s2009_s26, 1  ;;  %v474_v33 = vlaneseq }
  0x61   : > { %616 = vmatprep.mubr.bf16.mxu1 %v2025_v0  ;;  %447 = vmatprep.mubr.bf16.mxu0 %v2025_v0  ;;  %v362_v3 = vld [vmem:[%s2229_s8 + $0x20] sm:$0xff]  ;;  %v366_v4 = vpack.c.bf16 %v360_v2, %v358_v1  ;;  %v364_v5 = vld [vmem:[%s2229_s8 + $0x30] sm:$0xff]  ;;  %v359_v6 = vld [vmem:[%s2229_s8 + $0x8] sm:$0xff]  ;;  %s335_s7 = scalar_lea.vmem [#allocation8], %s1558_s15  ;;  %s1593_s5 = sshll.u32 %s2009_s26, 10 }
  0x62   : > { %v361_v7 = vld [vmem:[%s2229_s8 + $0x18] sm:$0xff]  ;;  %v363_v9 = vld [vmem:[%s2229_s8 + $0x28] sm:$0xff]  ;;  %v368_v11 = vpack.c.bf16 %v364_v5, %v362_v3  ;;  %s337_s10 = scalar_select %p336_p0, %s2009_s26, 1  ;;  %v475_v34 = vshrl.u32 %v474_v33, 7 }
  0x63   : > { %v367_v8 = vpack.c.bf16 %v361_v7, %v359_v6  ;;  %v365_v10 = vld [vmem:[%s2229_s8 + $0x38] sm:$0xff]  ;;  %484 = vxpose.xlu0.c.b16.start [1/2] (short) %v366_v4, 128  ;;  %v1671_v12 = vld [vmem:[%s298_s22 + $0x4] ss:$8 sps:$4 sm:$0xff]   ;;  %v1673_v13 = vld [vmem:[%s298_s22] ss:$8 sps:$4 sm:$0xff]   ;;  %s1429_s15 = sshll.u32 %s335_s7, 4  ;;  %s2928_s17 = scalar_lea.hbm %s2985_s6, %s1593_s5  ;;  %s2930_s15 = int_to_ptr.vmem [resolvable:$true] %s1429_s15 }
  0x64   : > { %v369_v14 = vpack.c.bf16 %v365_v10, %v363_v9  ;;  %v1674_v15 = vld [vmem:[%s298_s22 + $0x14] ss:$8 sps:$4 sm:$0xff]   ;;  %584 = vmatprep.subr.bf16.mxu1 %v1671_v12  ;;  %v1676_v16 = vld [vmem:[%s298_s22 + $0x10] ss:$8 sps:$4 sm:$0xff]   ;;  %s1561_s16 = sshll.u32 %s337_s10, 1  ;;  %v476_v35 = vsub.s32 0, %v475_v34 }
  0x65   : > { %500 = vxpose.xlu1.c.b16.start [1/2] (short) %v367_v8, 128  ;;  %415 = vmatprep.subr.bf16.mxu0 %v367_v8  ;;  %s339_s18 = scalar_lea.vmem %s2981_s2, %s1561_s16  ;;  %v480_v37 = vsub.s32 1, %v475_v34  ;;  %s1416_s26 = scalar_lea.sflag [#allocation5], %s2223_s9 }
  0x66   : > { %416 = vmatpush1.bf16.msra.mxu0 %v366_v4  ;;  %585 = vmatpush1.bf16.msra.mxu1 %v1673_v13  ;;  %v472_v36 = vld [vmem:[%s339_s18] sm:$0x3]  ;;  %s1373_s18 = sld [smem:[#allocation2]]  ;;  %p3088_p11 = scmp.ne.s32.totalorder %s3017_s11, 0 }
  0x67   : > { %417 = vmatprep.subr.bf16.mxu0 %v369_v14  ;;  %485 = vxpose.xlu0.c.b16.end [2/2] (short) %v368_v11, 128  ;;  %v2289_v38 = vrot.slane %v472_v36, %v476_v35  ;;  %v2291_v39 = vrot.slane %v472_v36, %v480_v37  ;;  %s2026_s0 = smov [#allocation8]  }
  0x68   : > { %586 = vmatprep.subr.bf16.mxu1 %v1674_v15  ;;  %s1935_s14 = sshll.u32 %s2026_s0, 4  ;;  %s1936_s14 = int_to_ptr.vmem [resolvable:$false] %s1935_s14 }
  0x69   : > { %501 = vxpose.xlu1.c.b16.end [2/2] (short) %v369_v14, 128  ;;  %s1937_s22 = scalar_lea.vmem %s1936_s14, 2048  ;;  %p1938_p10 = scmp.lt.s32.totalorder %s2930_s15, %s1936_s14 }
  0x6a   : > { %418 = vmatpush1.bf16.msra.mxu0 %v368_v11  ;;  %587 = vmatpush1.bf16.msra.mxu1 %v1676_v16 }
  0x6d   : > { %1670 = vset.pattern.permute.xlu1 %v2025_v0 }
  0x70   : > { %1669 = vset.pattern.permute.xlu0 %v2025_v0 }
  0xc9   : > { %v492_v17 = vpop.trf.xlu0 }
  0xca   : > { %1570 = vmatmul.mubr.msk.bf16.vlgmr.msra.gmra.mrb[0].mxu1 %vm408_vm0, %v492_v17 }
  0xcb   : > { %626 = vmatprep.mubr.bf16.mxu1 %v2025_v0  ;;  %v508_v25 = vpop.trf.xlu1 }
  0xcd   : > { %v493_v18 = vpop.trf.xlu0 }
  0xcf   : > { %v509_v26 = vpop.trf.xlu1 }
  0xd1   : > { %v494_v19 = vpop.trf.xlu0 }
  0xd2   : > { %1571 = vmatmul.mubr.msk.bf16.gmra.mrb[4].mxu1 %vm408_vm0, %v493_v18 }
  0xd3   : > { %636 = vmatprep.mubr.bf16.mxu1 %v2025_v0  ;;  %v510_v27 = vpop.trf.xlu1 }
  0xd5   : > { %v495_v20 = vpop.trf.xlu0 }
  0xd7   : > { %v511_v28 = vpop.trf.xlu1 }
  0xd9   : > { %v496_v21 = vpop.trf.xlu0 }
  0xda   : > { %1572 = vmatmul.mubr.msk.bf16.gmra.mrb[8].mxu1 %vm408_vm0, %v494_v19 }
  0xdb   : > { %646 = vmatprep.mubr.bf16.mxu1 %v2025_v0  ;;  %v512_v29 = vpop.trf.xlu1 }
  0xdd   : > { %v497_v22 = vpop.trf.xlu0 }
  0xdf   : > { %v513_v30 = vpop.trf.xlu1 }
  0xe1   : > { %v498_v23 = vpop.trf.xlu0 }
  0xe2   : > { %1573 = vmatmul.mubr.msk.bf16.gmra.mrb[12].mxu1 %vm408_vm0, %v495_v20 }
  0xe3   : > { %656 = vmatprep.mubr.bf16.mxu1 %v2025_v0  ;;  %v514_v31 = vpop.trf.xlu1 }
  0xe5   : > { %v499_v24 = vpop.trf.xlu0 }
  0xe7   : > { %v515_v32 = vpop.trf.xlu1 }
  0xea   : > { %1574 = vmatmul.mubr.msk.bf16.gmra.mrb[16].mxu1 %vm408_vm0, %v496_v21 }
  0xeb   : > { %666 = vmatprep.mubr.bf16.mxu1 %v2025_v0 }
  0xf2   : > { %1575 = vmatmul.mubr.msk.bf16.gmra.mrb[20].mxu1 %vm408_vm0, %v497_v22 }
  0xf3   : > { %676 = vmatprep.mubr.bf16.mxu1 %v2025_v0 }
  0xfa   : > { %1576 = vmatmul.mubr.msk.bf16.gmra.mrb[24].mxu1 %vm408_vm0, %v498_v23 }
  0xfb   : > { %686 = vmatprep.mubr.bf16.mxu1 %v2025_v0 }
 0x102   : > { %1577 = vmatmul.mubr.msk.bf16.gmra.mrb[28].mxu1 %vm408_vm0, %v499_v24 }
 0x103   : > { %696 = vmatprep.mubr.bf16.mxu1 %v2025_v0 }
 0x10a   : > { %1578 = vmatmul.mubr.msk.bf16.gmra.mrb[32].mxu1 %vm408_vm0, %v508_v25 }
 0x10b   : > { %706 = vmatprep.mubr.bf16.mxu1 %v2025_v0 }
 0x112   : > { %1579 = vmatmul.mubr.msk.bf16.gmra.mrb[36].mxu1 %vm408_vm0, %v509_v26 }
 0x113   : > { %716 = vmatprep.mubr.bf16.mxu1 %v2025_v0 }
 0x11a   : > { %1580 = vmatmul.mubr.msk.bf16.gmra.mrb[40].mxu1 %vm408_vm0, %v510_v27 }
 0x11b   : > { %726 = vmatprep.mubr.bf16.mxu1 %v2025_v0 }
 0x122   : > { %1581 = vmatmul.mubr.msk.bf16.gmra.mrb[44].mxu1 %vm408_vm0, %v511_v28 }
 0x123   : > { %736 = vmatprep.mubr.bf16.mxu1 %v2025_v0 }
 0x12a   : > { %1582 = vmatmul.mubr.msk.bf16.gmra.mrb[48].mxu1 %vm408_vm0, %v512_v29 }
 0x12b   : > { %746 = vmatprep.mubr.bf16.mxu1 %v2025_v0 }
 0x132   : > { %1583 = vmatmul.mubr.msk.bf16.gmra.mrb[52].mxu1 %vm408_vm0, %v513_v30 }
 0x133   : > { %756 = vmatprep.mubr.bf16.mxu1 %v2025_v0 }
 0x13a   : > { %1584 = vmatmul.mubr.msk.bf16.gmra.mrb[56].mxu1 %vm408_vm0, %v514_v31 }
 0x13b   : > { %766 = vmatprep.mubr.bf16.mxu1 %v2025_v0 }
 0x142   : > { %1585 = vmatmul.mubr.msk.bf16.gmra.mrb[60].mxu1 %vm408_vm0, %v515_v32 }
 0x19d   : > { %v618_v40 = vpop.f32.mrb[0].mxu1 }
 0x19e   : > { %v2294_v41 = vadd.f32 %v618_v40, %v2289_v38  ;;  %v620_v42 = vpop.f32.mrb[1].mxu1 }
 0x19f   : > { %v2297_v43 = vadd.f32 %v620_v42, %v2291_v39  ;;  %v622_v44 = vpop.f32.mrb[2].mxu1 }
 0x1a0   : > { %v2300_v45 = vadd.f32 %v622_v44, %v2289_v38  ;;  %v624_v46 = vpop.f32.mrb[3].mxu1 }
 0x1a1   : > { %v2303_v47 = vadd.f32 %v624_v46, %v2291_v39  ;;  %v777_v48 = vmax.f32 %v2294_v41, %v2297_v43 }
 0x1a3   : > { %778 = vmax.xlane.f32.xlu0 %v777_v48  ;;  %v780_v49 = vmax.f32 %v2300_v45, %v2303_v47 }
 0x1a5   : > { %781 = vmax.xlane.f32.xlu1 %v780_v49  ;;  %v628_v50 = vpop.f32.mrb[4].mxu1 }
 0x1a6   : > { %v2310_v51 = vadd.f32 %v628_v50, %v2289_v38  ;;  %v630_v52 = vpop.f32.mrb[5].mxu1 }
 0x1a7   : > { %v2313_v53 = vadd.f32 %v630_v52, %v2291_v39  ;;  %v632_v54 = vpop.f32.mrb[6].mxu1 }
 0x1a8   : > { %v2316_v55 = vadd.f32 %v632_v54, %v2289_v38  ;;  %v634_v56 = vpop.f32.mrb[7].mxu1 }
 0x1a9   : > { %v2319_v57 = vadd.f32 %v634_v56, %v2291_v39  ;;  %v783_v58 = vmax.f32 %v2310_v51, %v2313_v53 }
 0x1ab   : > { %784 = vmax.xlane.f32.xlu0 %v783_v58  ;;  %v786_v59 = vmax.f32 %v2316_v55, %v2319_v57 }
 0x1ad   : > { %787 = vmax.xlane.f32.xlu1 %v786_v59  ;;  %v638_v60 = vpop.f32.mrb[8].mxu1 }
 0x1ae   : > { %v2326_v61 = vadd.f32 %v638_v60, %v2289_v38  ;;  %v640_v62 = vpop.f32.mrb[9].mxu1 }
 0x1af   : > { %v2329_v63 = vadd.f32 %v640_v62, %v2291_v39  ;;  %v642_v1 = vpop.f32.mrb[10].mxu1 }
 0x1b0   : > { %v2332_v2 = vadd.f32 %v642_v1, %v2289_v38  ;;  %v644_v3 = vpop.f32.mrb[11].mxu1 }
 0x1b1   : > { %v2335_v4 = vadd.f32 %v644_v3, %v2291_v39  ;;  %v789_v5 = vmax.f32 %v2326_v61, %v2329_v63 }
 0x1b3   : > { %790 = vmax.xlane.f32.xlu0 %v789_v5  ;;  %v792_v6 = vmax.f32 %v2332_v2, %v2335_v4 }
 0x1b5   : > { %793 = vmax.xlane.f32.xlu1 %v792_v6  ;;  %v648_v7 = vpop.f32.mrb[12].mxu1 }
 0x1b6   : > { %v2342_v8 = vadd.f32 %v648_v7, %v2289_v38  ;;  %v650_v9 = vpop.f32.mrb[13].mxu1 }
 0x1b7   : > { %v2345_v10 = vadd.f32 %v650_v9, %v2291_v39  ;;  %v652_v11 = vpop.f32.mrb[14].mxu1 }
 0x1b8   : > { %v2348_v12 = vadd.f32 %v652_v11, %v2289_v38  ;;  %v654_v13 = vpop.f32.mrb[15].mxu1 }
 0x1b9   : > { %v2351_v14 = vadd.f32 %v654_v13, %v2291_v39  ;;  %v795_v15 = vmax.f32 %v2342_v8, %v2345_v10 }
 0x1bb   : > { %796 = vmax.xlane.f32.xlu0 %v795_v15  ;;  %v798_v16 = vmax.f32 %v2348_v12, %v2351_v14 }
 0x1bd   : > { %799 = vmax.xlane.f32.xlu1 %v798_v16  ;;  %v658_v17 = vpop.f32.mrb[16].mxu1 }
 0x1be   : > { %v2358_v18 = vadd.f32 %v658_v17, %v2289_v38  ;;  %v660_v19 = vpop.f32.mrb[17].mxu1 }
 0x1bf   : > { %v2361_v20 = vadd.f32 %v660_v19, %v2291_v39  ;;  %v662_v21 = vpop.f32.mrb[18].mxu1 }
 0x1c0   : > { %v2364_v22 = vadd.f32 %v662_v21, %v2289_v38  ;;  %v664_v23 = vpop.f32.mrb[19].mxu1 }
 0x1c1   : > { %v2367_v24 = vadd.f32 %v664_v23, %v2291_v39  ;;  %v801_v25 = vmax.f32 %v2358_v18, %v2361_v20 }
 0x1c3   : > { %802 = vmax.xlane.f32.xlu0 %v801_v25  ;;  %v804_v26 = vmax.f32 %v2364_v22, %v2367_v24 }
 0x1c5   : > { %805 = vmax.xlane.f32.xlu1 %v804_v26  ;;  %v668_v27 = vpop.f32.mrb[20].mxu1 }
 0x1c6   : > { %v2374_v28 = vadd.f32 %v668_v27, %v2289_v38  ;;  %v670_v29 = vpop.f32.mrb[21].mxu1 }
 0x1c7   : > { %v2377_v30 = vadd.f32 %v670_v29, %v2291_v39  ;;  %v672_v31 = vpop.f32.mrb[22].mxu1 }
 0x1c8   : > { %v2380_v32 = vadd.f32 %v672_v31, %v2289_v38  ;;  %v674_v33 = vpop.f32.mrb[23].mxu1 }
 0x1c9   : > { %v2383_v34 = vadd.f32 %v674_v33, %v2291_v39  ;;  %v807_v35 = vmax.f32 %v2374_v28, %v2377_v30 }
 0x1cb   : > { %808 = vmax.xlane.f32.xlu0 %v807_v35  ;;  %v810_v36 = vmax.f32 %v2380_v32, %v2383_v34 }
 0x1cd   : > { %811 = vmax.xlane.f32.xlu1 %v810_v36  ;;  %v678_v37 = vpop.f32.mrb[24].mxu1 }
 0x1ce   : > { %v2390_v40 = vadd.f32 %v678_v37, %v2289_v38  ;;  %v680_v42 = vpop.f32.mrb[25].mxu1 }
 0x1cf   : > { %v2393_v44 = vadd.f32 %v680_v42, %v2291_v39  ;;  %v682_v46 = vpop.f32.mrb[26].mxu1 }
 0x1d0   : > { %v2396_v48 = vadd.f32 %v682_v46, %v2289_v38  ;;  %v684_v49 = vpop.f32.mrb[27].mxu1 }
 0x1d1   : > { %v2399_v50 = vadd.f32 %v684_v49, %v2291_v39  ;;  %v813_v52 = vmax.f32 %v2390_v40, %v2393_v44 }
 0x1d3   : > { %814 = vmax.xlane.f32.xlu0 %v813_v52  ;;  %v816_v54 = vmax.f32 %v2396_v48, %v2399_v50  ;;  %v1677_v52 = vld [vmem:[%s2982_s3] sm:$0xff]  }
 0x1d4   : > { %1564 = vmatmul.mubr.msk.bf16.vlgmr.msra.gmra.mrb[0].mxu0 %vm408_vm0, %v1677_v52 }
 0x1d5   : > { %817 = vmax.xlane.f32.xlu1 %v816_v54  ;;  %v688_v56 = vpop.f32.mrb[28].mxu1  ;;  %457 = vmatprep.mubr.bf16.mxu0 %v2025_v0 }
 0x1d6   : > { %v2406_v58 = vadd.f32 %v688_v56, %v2289_v38  ;;  %v690_v59 = vpop.f32.mrb[29].mxu1 }
 0x1d7   : > { %v2409_v60 = vadd.f32 %v690_v59, %v2291_v39  ;;  %v692_v62 = vpop.f32.mrb[30].mxu1 }
 0x1d8   : > { %v2412_v1 = vadd.f32 %v692_v62, %v2289_v38  ;;  %v694_v3 = vpop.f32.mrb[31].mxu1 }
 0x1d9   : > { %v2415_v5 = vadd.f32 %v694_v3, %v2291_v39  ;;  %v819_v6 = vmax.f32 %v2406_v58, %v2409_v60 }
 0x1db   : > { %820 = vmax.xlane.f32.xlu0 %v819_v6  ;;  %v822_v7 = vmax.f32 %v2412_v1, %v2415_v5 }
 0x1dd   : > { %v698_v9 = vpop.f32.mrb[32].mxu1  ;;  %823 = vmax.xlane.f32.xlu1 %v822_v7 }
 0x1de   : > { %v2422_v11 = vadd.f32 %v698_v9, %v2289_v38  ;;  %v700_v13 = vpop.f32.mrb[33].mxu1 }
 0x1df   : > { %v2425_v15 = vadd.f32 %v700_v13, %v2291_v39  ;;  %v702_v16 = vpop.f32.mrb[34].mxu1 }
 0x1e0   : > { %v2428_v17 = vadd.f32 %v702_v16, %v2289_v38  ;;  %v704_v19 = vpop.f32.mrb[35].mxu1 }
 0x1e1   : > { %v2431_v21 = vadd.f32 %v704_v19, %v2291_v39  ;;  %v825_v23 = vmax.f32 %v2422_v11, %v2425_v15  ;;  %v1678_v19 = vld [vmem:[%s2982_s3 + $0x8] sm:$0xff]  }
 0x1e2   : > { %1565 = vmatmul.mubr.msk.bf16.gmra.mrb[4].mxu0 %vm408_vm0, %v1678_v19 }
 0x1e3   : > { %826 = vmax.xlane.f32.xlu0 %v825_v23  ;;  %v828_v25 = vmax.f32 %v2428_v17, %v2431_v21 }
 0x1e5   : > { %v708_v26 = vpop.f32.mrb[36].mxu1  ;;  %829 = vmax.xlane.f32.xlu1 %v828_v25 }
 0x1e6   : > { %v2438_v27 = vadd.f32 %v708_v26, %v2289_v38  ;;  %v710_v29 = vpop.f32.mrb[37].mxu1 }
 0x1e7   : > { %v2441_v31 = vadd.f32 %v710_v29, %v2291_v39  ;;  %v712_v33 = vpop.f32.mrb[38].mxu1 }
 0x1e8   : > { %v2444_v35 = vadd.f32 %v712_v33, %v2289_v38  ;;  %v714_v36 = vpop.f32.mrb[39].mxu1 }
 0x1e9   : > { %v2447_v37 = vadd.f32 %v714_v36, %v2291_v39  ;;  %v831_v42 = vmax.f32 %v2438_v27, %v2441_v31 }
 0x1eb   : > { %832 = vmax.xlane.f32.xlu0 %v831_v42  ;;  %v834_v46 = vmax.f32 %v2444_v35, %v2447_v37 }
 0x1ed   : > { %v718_v49 = vpop.f32.mrb[40].mxu1  ;;  %835 = vmax.xlane.f32.xlu1 %v834_v46 }
 0x1ee   : > { %v2457_v54 = vadd.f32 %v718_v49, %v2289_v38  ;;  %v720_v56 = vpop.f32.mrb[41].mxu1 }
 0x1ef   : > { %v2460_v59 = vadd.f32 %v720_v56, %v2291_v39  ;;  %v722_v62 = vpop.f32.mrb[42].mxu1 }
 0x1f0   : > { %v2464_v3 = vadd.f32 %v722_v62, %v2289_v38  ;;  %v724_v6 = vpop.f32.mrb[43].mxu1 }
 0x1f1   : > { %v2468_v7 = vadd.f32 %v724_v6, %v2291_v39  ;;  %v837_v9 = vmax.f32 %v2457_v54, %v2460_v59 }
 0x1f3   : > { %838 = vmax.xlane.f32.xlu0 %v837_v9  ;;  %v840_v13 = vmax.f32 %v2464_v3, %v2468_v7 }
 0x1f5   : > { %v728_v16 = vpop.f32.mrb[44].mxu1  ;;  %841 = vmax.xlane.f32.xlu1 %v840_v13 }
 0x1f6   : > { %v2478_v23 = vadd.f32 %v728_v16, %v2289_v38  ;;  %v730_v0 = vpop.f32.mrb[45].mxu1 }
 0x1f7   : > { %v2481_v25 = vadd.f32 %v730_v0, %v2291_v39  ;;  %v732_v26 = vpop.f32.mrb[46].mxu1 }
 0x1f8   : > { %v2485_v29 = vadd.f32 %v732_v26, %v2289_v38  ;;  %v734_v33 = vpop.f32.mrb[47].mxu1 }
 0x1f9   : > { %v2488_v36 = vadd.f32 %v734_v33, %v2291_v39  ;;  %v843_v42 = vmax.f32 %v2478_v23, %v2481_v25 }
 0x1fb   : > { %844 = vmax.xlane.f32.xlu0 %v843_v42  ;;  %v846_v46 = vmax.f32 %v2485_v29, %v2488_v36 }
 0x1fd   : > { %v738_v49 = vpop.f32.mrb[48].mxu1  ;;  %847 = vmax.xlane.f32.xlu1 %v846_v46 }
 0x1fe   : > { %v2495_v52 = vadd.f32 %v738_v49, %v2289_v38  ;;  %v740_v56 = vpop.f32.mrb[49].mxu1 }
 0x1ff   : > { %v2498_v62 = vadd.f32 %v740_v56, %v2291_v39  ;;  %v742_v6 = vpop.f32.mrb[50].mxu1 }
 0x200   : > { %v2501_v9 = vadd.f32 %v742_v6, %v2289_v38  ;;  %v744_v13 = vpop.f32.mrb[51].mxu1 }
 0x201   : > { %3024 = vst [vmem:[#allocation12_spill] sm:$0xff] %v2498_v62  ;;  %v2504_v16 = vadd.f32 %v744_v13, %v2291_v39  ;;  %v849_v19 = vmax.f32 %v2495_v52, %v2498_v62 }
 0x202   : > { %3025 = vst [vmem:[#allocation13_spill] sm:$0xff] %v2501_v9 }
 0x203   : > { %3026 = vst [vmem:[#allocation14_spill] sm:$0xff] %v2504_v16  ;;  %850 = vmax.xlane.f32.xlu0 %v849_v19  ;;  %v852_v0 = vmax.f32 %v2501_v9, %v2504_v16 }
 0x205   : > { %v748_v26 = vpop.f32.mrb[52].mxu1  ;;  %853 = vmax.xlane.f32.xlu1 %v852_v0 }
 0x206   : > { %v2511_v33 = vadd.f32 %v748_v26, %v2289_v38  ;;  %v750_v42 = vpop.f32.mrb[53].mxu1 }
 0x207   : > { %v2514_v46 = vadd.f32 %v750_v42, %v2291_v39  ;;  %v752_v49 = vpop.f32.mrb[54].mxu1 }
 0x208   : > { %3027 = vst [vmem:[#allocation15_spill] sm:$0xff] %v2511_v33  ;;  %v2517_v56 = vadd.f32 %v752_v49, %v2289_v38  ;;  %v754_v6 = vpop.f32.mrb[55].mxu1 }
 0x209   : > { %3028 = vst [vmem:[#allocation16_spill] sm:$0xff] %v2514_v46  ;;  %v2520_v13 = vadd.f32 %v754_v6, %v2291_v39  ;;  %v855_v19 = vmax.f32 %v2511_v33, %v2514_v46 }
 0x20a   : > { %3029 = vst [vmem:[#allocation17_spill] sm:$0xff] %v2517_v56 }
 0x20b   : > { %3030 = vst [vmem:[#allocation18_spill] sm:$0xff] %v2520_v13  ;;  %856 = vmax.xlane.f32.xlu0 %v855_v19  ;;  %v858_v0 = vmax.f32 %v2517_v56, %v2520_v13 }
 0x20d   : > { %v758_v26 = vpop.f32.mrb[56].mxu1  ;;  %859 = vmax.xlane.f32.xlu1 %v858_v0 }
 0x20e   : > { %v2527_v42 = vadd.f32 %v758_v26, %v2289_v38  ;;  %v760_v16 = vpop.f32.mrb[57].mxu1 }
 0x20f   : > { %v2530_v49 = vadd.f32 %v760_v16, %v2291_v39  ;;  %v762_v9 = vpop.f32.mrb[58].mxu1 }
 0x210   : > { %3031 = vst [vmem:[#allocation19_spill] sm:$0xff] %v2527_v42  ;;  %v2533_v6 = vadd.f32 %v762_v9, %v2289_v38  ;;  %v764_v62 = vpop.f32.mrb[59].mxu1 }
 0x211   : > { %3032 = vst [vmem:[#allocation20_spill] sm:$0xff] %v2530_v49  ;;  %v2536_v46 = vadd.f32 %v764_v62, %v2291_v39  ;;  %v861_v19 = vmax.f32 %v2527_v42, %v2530_v49 }
 0x212   : > { %3033 = vst [vmem:[#allocation21_spill] sm:$0xff] %v2533_v6 }
 0x213   : > { %3034 = vst [vmem:[#allocation22_spill] sm:$0xff] %v2536_v46  ;;  %862 = vmax.xlane.f32.xlu0 %v861_v19  ;;  %v864_v0 = vmax.f32 %v2533_v6, %v2536_v46 }
 0x215   : > { %v768_v26 = vpop.f32.mrb[60].mxu1  ;;  %865 = vmax.xlane.f32.xlu1 %v864_v0 }
 0x216   : > { %v2543_v16 = vadd.f32 %v768_v26, %v2289_v38  ;;  %v770_v13 = vpop.f32.mrb[61].mxu1 }
 0x217   : > { %v2546_v9 = vadd.f32 %v770_v13, %v2291_v39  ;;  %v772_v56 = vpop.f32.mrb[62].mxu1 }
 0x218   : > { %v2549_v62 = vadd.f32 %v772_v56, %v2289_v38  ;;  %v774_v33 = vpop.f32.mrb[63].mxu1 }
 0x219   : > { %3035 = vst [vmem:[#allocation23_spill] sm:$0xff] %v2546_v9  ;;  %v2552_v49 = vadd.f32 %v774_v33, %v2291_v39  ;;  %v867_v19 = vmax.f32 %v2543_v16, %v2546_v9 }
 0x21b   : > { %3036 = vst [vmem:[#allocation24_spill] sm:$0xff] %v2552_v49  ;;  %868 = vmax.xlane.f32.xlu0 %v867_v19  ;;  %v870_v0 = vmax.f32 %v2549_v62, %v2552_v49 }
 0x21d   : > { %871 = vmax.xlane.f32.xlu1 %v870_v0 }
 0x230   : > { %v779_v26 = vpop.xlane.xlu0 %778 }
 0x231   : > { %v873_v13 = vsub.f32 %v2294_v41, %v779_v26  ;;  %v874_v46 = vsub.f32 %v2297_v43, %v779_v26 }
 0x232   : > { %v782_v6 = vpop.xlane.xlu1 %781 }
 0x233   : > { %v937_v38 = vmul.f32 1.442695, %v873_v13  ;;  %v939_v56 = vmul.f32 1.442695, %v874_v46  ;;  %v875_v42 = vsub.f32 %v2300_v45, %v782_v6  ;;  %v876_v39 = vsub.f32 %v2303_v47, %v782_v6 }
 0x235   : > { %1679 = vpow2.f32 %v937_v38  ;;  %v941_v33 = vmul.f32 1.442695, %v875_v42  ;;  %v943_v9 = vmul.f32 1.442695, %v876_v39 }
 0x236   : > { %1681 = vpow2.f32 %v939_v56 }
 0x237   : > { %1683 = vpow2.f32 %v941_v33 }
 0x238   : > { %1685 = vpow2.f32 %v943_v9  ;;  %v785_v19 = vpop.xlane.xlu0 %784 }
 0x239   : > { %v877_v0 = vsub.f32 %v2310_v51, %v785_v19  ;;  %v878_v41 = vsub.f32 %v2313_v53, %v785_v19 }
 0x23a   : > { %v788_v49 = vpop.xlane.xlu1 %787 }
 0x23b   : > { %v945_v43 = vmul.f32 1.442695, %v877_v0  ;;  %v947_v26 = vmul.f32 1.442695, %v878_v41  ;;  %v879_v46 = vsub.f32 %v2316_v55, %v788_v49  ;;  %v880_v45 = vsub.f32 %v2319_v57, %v788_v49 }
 0x23d   : > { %1687 = vpow2.f32 %v945_v43  ;;  %v949_v47 = vmul.f32 1.442695, %v879_v46  ;;  %v951_v6 = vmul.f32 1.442695, %v880_v45 }
 0x23e   : > { %1689 = vpow2.f32 %v947_v26 }
 0x23f   : > { %v2566_v42 = vpop.eup %1679  ;;  %1691 = vpow2.f32 %v949_v47 }
 0x240   : > { %v2568_v9 = vpop.eup %1681  ;;  %1693 = vpow2.f32 %v951_v6  ;;  %v791_v51 = vpop.xlane.xlu0 %790 }
 0x241   : > { %v2570_v13 = vpop.eup %1683  ;;  %v881_v53 = vsub.f32 %v2326_v61, %v791_v51  ;;  %v882_v38 = vsub.f32 %v2329_v63, %v791_v51  ;;  %v1065_v55 = vadd.f32 %v2568_v9, %v2566_v42 }
 0x242   : > { %v2576_v57 = vpop.eup %1685  ;;  %v794_v49 = vpop.xlane.xlu1 %793 }
 0x243   : > { %v953_v56 = vmul.f32 1.442695, %v881_v53  ;;  %v955_v39 = vmul.f32 1.442695, %v882_v38  ;;  %v883_v33 = vsub.f32 %v2332_v2, %v794_v49  ;;  %v884_v19 = vsub.f32 %v2335_v4, %v794_v49  ;;  %1066 = vadd.xlane.f32.xlu0 %v1065_v55 }
 0x244   : > { %v1068_v0 = vadd.f32 %v2576_v57, %v2570_v13 }
 0x245   : > { %1695 = vpow2.f32 %v953_v56  ;;  %v957_v61 = vmul.f32 1.442695, %v883_v33  ;;  %v959_v41 = vmul.f32 1.442695, %v884_v19 }
 0x246   : > { %1697 = vpow2.f32 %v955_v39  ;;  %1069 = vadd.xlane.f32.xlu1 %v1068_v0 }
 0x247   : > { %v2582_v63 = vpop.eup %1687  ;;  %1699 = vpow2.f32 %v957_v61 }
 0x248   : > { %v2584_v43 = vpop.eup %1689  ;;  %1701 = vpow2.f32 %v959_v41  ;;  %v797_v26 = vpop.xlane.xlu0 %796 }
 0x249   : > { %v2586_v46 = vpop.eup %1691  ;;  %v885_v2 = vsub.f32 %v2342_v8, %v797_v26  ;;  %v886_v4 = vsub.f32 %v2345_v10, %v797_v26  ;;  %v1071_v45 = vadd.f32 %v2584_v43, %v2582_v63 }
 0x24a   : > { %v2592_v47 = vpop.eup %1693  ;;  %v800_v6 = vpop.xlane.xlu1 %799 }
 0x24b   : > { %v961_v51 = vmul.f32 1.442695, %v885_v2  ;;  %v963_v53 = vmul.f32 1.442695, %v886_v4  ;;  %v887_v38 = vsub.f32 %v2348_v12, %v800_v6  ;;  %v888_v55 = vsub.f32 %v2351_v14, %v800_v6  ;;  %1072 = vadd.xlane.f32.xlu0 %v1071_v45 }
 0x24c   : > { %v1074_v49 = vadd.f32 %v2592_v47, %v2586_v46 }
 0x24d   : > { %1703 = vpow2.f32 %v961_v51  ;;  %v965_v8 = vmul.f32 1.442695, %v887_v38  ;;  %v967_v56 = vmul.f32 1.442695, %v888_v55 }
 0x24e   : > { %1705 = vpow2.f32 %v963_v53  ;;  %1075 = vadd.xlane.f32.xlu1 %v1074_v49 }
 0x24f   : > { %v2598_v10 = vpop.eup %1695  ;;  %1707 = vpow2.f32 %v965_v8 }
 0x250   : > { %v2600_v39 = vpop.eup %1697  ;;  %1709 = vpow2.f32 %v967_v56  ;;  %v803_v33 = vpop.xlane.xlu0 %802 }
 0x251   : > { %v2602_v19 = vpop.eup %1699  ;;  %v889_v12 = vsub.f32 %v2358_v18, %v803_v33  ;;  %v890_v14 = vsub.f32 %v2361_v20, %v803_v33  ;;  %v1077_v0 = vadd.f32 %v2600_v39, %v2598_v10 }
 0x252   : > { %v2608_v61 = vpop.eup %1701  ;;  %v806_v41 = vpop.xlane.xlu1 %805 }
 0x253   : > { %v969_v26 = vmul.f32 1.442695, %v889_v12  ;;  %v971_v2 = vmul.f32 1.442695, %v890_v14  ;;  %v891_v4 = vsub.f32 %v2364_v22, %v806_v41  ;;  %v892_v45 = vsub.f32 %v2367_v24, %v806_v41  ;;  %1078 = vadd.xlane.f32.xlu0 %v1077_v0 }
 0x254   : > { %v1080_v6 = vadd.f32 %v2608_v61, %v2602_v19 }
 0x255   : > { %1711 = vpow2.f32 %v969_v26  ;;  %v973_v18 = vmul.f32 1.442695, %v891_v4  ;;  %v975_v51 = vmul.f32 1.442695, %v892_v45 }
 0x256   : > { %1713 = vpow2.f32 %v971_v2  ;;  %1081 = vadd.xlane.f32.xlu1 %v1080_v6 }
 0x257   : > { %v2614_v20 = vpop.eup %1703  ;;  %1715 = vpow2.f32 %v973_v18 }
 0x258   : > { %v2616_v53 = vpop.eup %1705  ;;  %1717 = vpow2.f32 %v975_v51  ;;  %v809_v38 = vpop.xlane.xlu0 %808 }
 0x259   : > { %v2618_v55 = vpop.eup %1707  ;;  %v893_v22 = vsub.f32 %v2374_v28, %v809_v38  ;;  %v894_v24 = vsub.f32 %v2377_v30, %v809_v38  ;;  %v1083_v49 = vadd.f32 %v2616_v53, %v2614_v20 }
 0x25a   : > { %v2624_v8 = vpop.eup %1709  ;;  %v812_v56 = vpop.xlane.xlu1 %811 }
 0x25b   : > { %v977_v33 = vmul.f32 1.442695, %v893_v22  ;;  %v979_v12 = vmul.f32 1.442695, %v894_v24  ;;  %v895_v14 = vsub.f32 %v2380_v32, %v812_v56  ;;  %v896_v0 = vsub.f32 %v2383_v34, %v812_v56  ;;  %1084 = vadd.xlane.f32.xlu0 %v1083_v49 }
 0x25c   : > { %v1086_v41 = vadd.f32 %v2624_v8, %v2618_v55 }
 0x25d   : > { %1719 = vpow2.f32 %v977_v33  ;;  %v981_v28 = vmul.f32 1.442695, %v895_v14  ;;  %v983_v26 = vmul.f32 1.442695, %v896_v0 }
 0x25e   : > { %1721 = vpow2.f32 %v979_v12  ;;  %1087 = vadd.xlane.f32.xlu1 %v1086_v41 }
 0x25f   : > { %v2630_v30 = vpop.eup %1711  ;;  %1723 = vpow2.f32 %v981_v28 }
 0x260   : > { %v2632_v2 = vpop.eup %1713  ;;  %1725 = vpow2.f32 %v983_v26  ;;  %v815_v4 = vpop.xlane.xlu0 %814 }
 0x261   : > { %v2634_v45 = vpop.eup %1715  ;;  %v897_v32 = vsub.f32 %v2390_v40, %v815_v4  ;;  %v898_v34 = vsub.f32 %v2393_v44, %v815_v4  ;;  %v1089_v6 = vadd.f32 %v2632_v2, %v2630_v30 }
 0x262   : > { %v2640_v18 = vpop.eup %1717  ;;  %v818_v51 = vpop.xlane.xlu1 %817 }
 0x263   : > { %v985_v38 = vmul.f32 1.442695, %v897_v32  ;;  %v987_v22 = vmul.f32 1.442695, %v898_v34  ;;  %v899_v24 = vsub.f32 %v2396_v48, %v818_v51  ;;  %v900_v49 = vsub.f32 %v2399_v50, %v818_v51  ;;  %1090 = vadd.xlane.f32.xlu0 %v1089_v6 }
 0x264   : > { %v1092_v56 = vadd.f32 %v2640_v18, %v2634_v45 }
 0x265   : > { %1727 = vpow2.f32 %v985_v38  ;;  %v989_v40 = vmul.f32 1.442695, %v899_v24  ;;  %v991_v33 = vmul.f32 1.442695, %v900_v49 }
 0x266   : > { %1729 = vpow2.f32 %v987_v22  ;;  %1093 = vadd.xlane.f32.xlu1 %v1092_v56 }
 0x267   : > { %v2646_v44 = vpop.eup %1719  ;;  %1731 = vpow2.f32 %v989_v40 }
 0x268   : > { %v2648_v12 = vpop.eup %1721  ;;  %1733 = vpow2.f32 %v991_v33  ;;  %v821_v14 = vpop.xlane.xlu0 %820 }
 0x269   : > { %v2650_v0 = vpop.eup %1723  ;;  %v901_v48 = vsub.f32 %v2406_v58, %v821_v14  ;;  %v902_v50 = vsub.f32 %v2409_v60, %v821_v14  ;;  %v1095_v41 = vadd.f32 %v2648_v12, %v2646_v44 }
 0x26a   : > { %v2656_v28 = vpop.eup %1725  ;;  %v824_v26 = vpop.xlane.xlu1 %823 }
 0x26b   : > { %v993_v4 = vmul.f32 1.442695, %v901_v48  ;;  %v995_v32 = vmul.f32 1.442695, %v902_v50  ;;  %v903_v34 = vsub.f32 %v2412_v1, %v824_v26  ;;  %v904_v6 = vsub.f32 %v2415_v5, %v824_v26  ;;  %1096 = vadd.xlane.f32.xlu0 %v1095_v41 }
 0x26c   : > { %v1098_v51 = vadd.f32 %v2656_v28, %v2650_v0 }
 0x26d   : > { %1735 = vpow2.f32 %v993_v4  ;;  %v997_v58 = vmul.f32 1.442695, %v903_v34  ;;  %v999_v38 = vmul.f32 1.442695, %v904_v6 }
 0x26e   : > { %1737 = vpow2.f32 %v995_v32  ;;  %1099 = vadd.xlane.f32.xlu1 %v1098_v51 }
 0x26f   : > { %v2662_v60 = vpop.eup %1727  ;;  %1739 = vpow2.f32 %v997_v58 }
 0x270   : > { %v2664_v22 = vpop.eup %1729  ;;  %1741 = vpow2.f32 %v999_v38  ;;  %v827_v24 = vpop.xlane.xlu0 %826 }
 0x271   : > { %v2666_v49 = vpop.eup %1731  ;;  %v905_v1 = vsub.f32 %v2422_v11, %v827_v24  ;;  %v906_v5 = vsub.f32 %v2425_v15, %v827_v24  ;;  %v1101_v56 = vadd.f32 %v2664_v22, %v2662_v60 }
 0x272   : > { %v2672_v40 = vpop.eup %1733  ;;  %v830_v33 = vpop.xlane.xlu1 %829 }
 0x273   : > { %v1001_v14 = vmul.f32 1.442695, %v905_v1  ;;  %v1003_v48 = vmul.f32 1.442695, %v906_v5  ;;  %v907_v50 = vsub.f32 %v2428_v17, %v830_v33  ;;  %v908_v41 = vsub.f32 %v2431_v21, %v830_v33  ;;  %1102 = vadd.xlane.f32.xlu0 %v1101_v56 }
 0x274   : > { %v1104_v26 = vadd.f32 %v2672_v40, %v2666_v49 }
 0x275   : > { %1743 = vpow2.f32 %v1001_v14  ;;  %v1005_v11 = vmul.f32 1.442695, %v907_v50  ;;  %v1007_v4 = vmul.f32 1.442695, %v908_v41 }
 0x276   : > { %1745 = vpow2.f32 %v1003_v48  ;;  %1105 = vadd.xlane.f32.xlu1 %v1104_v26 }
 0x277   : > { %v2678_v15 = vpop.eup %1735  ;;  %1747 = vpow2.f32 %v1005_v11 }
 0x278   : > { %v2680_v32 = vpop.eup %1737  ;;  %1749 = vpow2.f32 %v1007_v4  ;;  %v833_v34 = vpop.xlane.xlu0 %832 }
 0x279   : > { %v2682_v6 = vpop.eup %1739  ;;  %v909_v17 = vsub.f32 %v2438_v27, %v833_v34  ;;  %v910_v21 = vsub.f32 %v2441_v31, %v833_v34  ;;  %v1107_v51 = vadd.f32 %v2680_v32, %v2678_v15 }
 0x27a   : > { %v2688_v58 = vpop.eup %1741  ;;  %v836_v38 = vpop.xlane.xlu1 %835 }
 0x27b   : > { %v1009_v24 = vmul.f32 1.442695, %v909_v17  ;;  %v1011_v1 = vmul.f32 1.442695, %v910_v21  ;;  %v911_v5 = vsub.f32 %v2444_v35, %v836_v38  ;;  %v912_v56 = vsub.f32 %v2447_v37, %v836_v38  ;;  %1108 = vadd.xlane.f32.xlu0 %v1107_v51 }
 0x27c   : > { %v1110_v33 = vadd.f32 %v2688_v58, %v2682_v6 }
 0x27d   : > { %1751 = vpow2.f32 %v1009_v24  ;;  %v1013_v27 = vmul.f32 1.442695, %v911_v5  ;;  %v1015_v14 = vmul.f32 1.442695, %v912_v56 }
 0x27e   : > { %1753 = vpow2.f32 %v1011_v1  ;;  %1111 = vadd.xlane.f32.xlu1 %v1110_v33 }
 0x27f   : > { %v2694_v31 = vpop.eup %1743  ;;  %1755 = vpow2.f32 %v1013_v27 }
 0x280   : > { %v2696_v48 = vpop.eup %1745  ;;  %1757 = vpow2.f32 %v1015_v14  ;;  %v839_v50 = vpop.xlane.xlu0 %838 }
 0x281   : > { %v2698_v41 = vpop.eup %1747  ;;  %v913_v35 = vsub.f32 %v2457_v54, %v839_v50  ;;  %v914_v37 = vsub.f32 %v2460_v59, %v839_v50  ;;  %v1113_v26 = vadd.f32 %v2696_v48, %v2694_v31 }
 0x282   : > { %v2704_v11 = vpop.eup %1749  ;;  %v842_v4 = vpop.xlane.xlu1 %841 }
 0x283   : > { %v1017_v34 = vmul.f32 1.442695, %v913_v35  ;;  %v1019_v17 = vmul.f32 1.442695, %v914_v37  ;;  %v915_v21 = vsub.f32 %v2464_v3, %v842_v4  ;;  %v916_v51 = vsub.f32 %v2468_v7, %v842_v4  ;;  %1114 = vadd.xlane.f32.xlu0 %v1113_v26 }
 0x284   : > { %v1116_v38 = vadd.f32 %v2704_v11, %v2698_v41 }
 0x285   : > { %1759 = vpow2.f32 %v1017_v34  ;;  %v1021_v54 = vmul.f32 1.442695, %v915_v21  ;;  %v1023_v24 = vmul.f32 1.442695, %v916_v51 }
 0x286   : > { %1761 = vpow2.f32 %v1019_v17  ;;  %1117 = vadd.xlane.f32.xlu1 %v1116_v38 }
 0x287   : > { %v2710_v59 = vpop.eup %1751  ;;  %1763 = vpow2.f32 %v1021_v54 }
 0x288   : > { %v2712_v1 = vpop.eup %1753  ;;  %1765 = vpow2.f32 %v1023_v24  ;;  %v845_v5 = vpop.xlane.xlu0 %844 }
 0x289   : > { %v2714_v56 = vpop.eup %1755  ;;  %v917_v3 = vsub.f32 %v2478_v23, %v845_v5  ;;  %v918_v7 = vsub.f32 %v2481_v25, %v845_v5  ;;  %v1119_v33 = vadd.f32 %v2712_v1, %v2710_v59 }
 0x28a   : > { %v2720_v27 = vpop.eup %1757  ;;  %v848_v14 = vpop.xlane.xlu1 %847 }
 0x28b   : > { %v1025_v50 = vmul.f32 1.442695, %v917_v3  ;;  %v1027_v35 = vmul.f32 1.442695, %v918_v7  ;;  %v919_v37 = vsub.f32 %v2485_v29, %v848_v14  ;;  %v920_v26 = vsub.f32 %v2488_v36, %v848_v14  ;;  %1120 = vadd.xlane.f32.xlu0 %v1119_v33  ;;  %v3038_v36 = vld [vmem:[#allocation12_spill] sm:$0xff]  ;;  %v3039_v33 = vld [vmem:[#allocation13_spill] sm:$0xff] }
 0x28c   : > { %v1122_v4 = vadd.f32 %v2720_v27, %v2714_v56 }
 0x28d   : > { %1767 = vpow2.f32 %v1025_v50  ;;  %v1029_v23 = vmul.f32 1.442695, %v919_v37  ;;  %v1031_v34 = vmul.f32 1.442695, %v920_v26  ;;  %v3040_v50 = vld [vmem:[#allocation14_spill] sm:$0xff] }
 0x28e   : > { %1769 = vpow2.f32 %v1027_v35  ;;  %1123 = vadd.xlane.f32.xlu1 %v1122_v4 }
 0x28f   : > { %v2726_v25 = vpop.eup %1759  ;;  %1771 = vpow2.f32 %v1029_v23 }
 0x290   : > { %v2728_v17 = vpop.eup %1761  ;;  %1773 = vpow2.f32 %v1031_v34  ;;  %v851_v21 = vpop.xlane.xlu0 %850 }
 0x291   : > { %v2730_v51 = vpop.eup %1763  ;;  %v921_v29 = vsub.f32 %v2495_v52, %v851_v21  ;;  %v922_v38 = vsub.f32 %v3038_v36, %v851_v21  ;;  %v1125_v54 = vadd.f32 %v2728_v17, %v2726_v25 }
 0x292   : > { %3037 = vst [vmem:[#allocation25_spill] sm:$0xff] %v2730_v51  ;;  %v2736_v24 = vpop.eup %1765  ;;  %v854_v5 = vpop.xlane.xlu1 %853 }
 0x293   : > { %v1033_v3 = vmul.f32 1.442695, %v921_v29  ;;  %v1035_v7 = vmul.f32 1.442695, %v922_v38  ;;  %v923_v14 = vsub.f32 %v3039_v33, %v854_v5  ;;  %v924_v35 = vsub.f32 %v3040_v50, %v854_v5  ;;  %1126 = vadd.xlane.f32.xlu0 %v1125_v54  ;;  %v3044_v29 = vld [vmem:[#allocation15_spill] sm:$0xff]  ;;  %v3045_v38 = vld [vmem:[#allocation16_spill] sm:$0xff] }
 0x294   : > { %v1128_v37 = vadd.f32 %v2736_v24, %v2730_v51  ;;  %v3047_v50 = vld [vmem:[#allocation17_spill] sm:$0xff] }
 0x295   : > { %1775 = vpow2.f32 %v1033_v3  ;;  %v1037_v52 = vmul.f32 1.442695, %v923_v14  ;;  %v1039_v26 = vmul.f32 1.442695, %v924_v35 }
 0x296   : > { %1777 = vpow2.f32 %v1035_v7  ;;  %1129 = vadd.xlane.f32.xlu1 %v1128_v37  ;;  %v3048_v37 = vld [vmem:[#allocation18_spill] sm:$0xff] }
 0x297   : > { %v2742_v4 = vpop.eup %1767  ;;  %1779 = vpow2.f32 %v1037_v52 }
 0x298   : > { %3041 = vst [vmem:[#allocation12_spill] sm:$0xff] %v2742_v4  ;;  %v2744_v23 = vpop.eup %1769  ;;  %1781 = vpow2.f32 %v1039_v26  ;;  %v857_v34 = vpop.xlane.xlu0 %856 }
 0x299   : > { %3042 = vst [vmem:[#allocation13_spill] sm:$0xff] %v2744_v23  ;;  %v2746_v21 = vpop.eup %1771  ;;  %v925_v36 = vsub.f32 %v3044_v29, %v857_v34  ;;  %v926_v54 = vsub.f32 %v3045_v38, %v857_v34  ;;  %v1131_v5 = vadd.f32 %v2744_v23, %v2742_v4  ;;  %v3052_v4 = vld [vmem:[#allocation22_spill] sm:$0xff] }
 0x29a   : > { %3043 = vst [vmem:[#allocation14_spill] sm:$0xff] %v2746_v21  ;;  %v2752_v3 = vpop.eup %1773  ;;  %v860_v7 = vpop.xlane.xlu1 %859 }
 0x29b   : > { %3046 = vst [vmem:[#allocation15_spill] sm:$0xff] %v2752_v3  ;;  %v1041_v33 = vmul.f32 1.442695, %v925_v36  ;;  %v1043_v14 = vmul.f32 1.442695, %v926_v54  ;;  %v927_v35 = vsub.f32 %v3047_v50, %v860_v7  ;;  %v928_v52 = vsub.f32 %v3048_v37, %v860_v7  ;;  %1132 = vadd.xlane.f32.xlu0 %v1131_v5  ;;  %v3049_v50 = vld [vmem:[#allocation19_spill] sm:$0xff] }
 0x29c   : > { %v1134_v26 = vadd.f32 %v2752_v3, %v2746_v21  ;;  %v3050_v5 = vld [vmem:[#allocation20_spill] sm:$0xff]  ;;  %v3051_v21 = vld [vmem:[#allocation21_spill] sm:$0xff] }
 0x29d   : > { %1783 = vpow2.f32 %v1041_v33  ;;  %v1045_v29 = vmul.f32 1.442695, %v927_v35  ;;  %v1047_v51 = vmul.f32 1.442695, %v928_v52 }
 0x29e   : > { %1785 = vpow2.f32 %v1043_v14  ;;  %1135 = vadd.xlane.f32.xlu1 %v1134_v26 }
 0x29f   : > { %v2758_v34 = vpop.eup %1775  ;;  %1787 = vpow2.f32 %v1045_v29 }
 0x2a0   : > { %v2760_v38 = vpop.eup %1777  ;;  %1789 = vpow2.f32 %v1047_v51  ;;  %v863_v36 = vpop.xlane.xlu0 %862 }
 0x2a1   : > { %v2762_v54 = vpop.eup %1779  ;;  %v929_v7 = vsub.f32 %v3049_v50, %v863_v36  ;;  %v930_v37 = vsub.f32 %v3050_v5, %v863_v36  ;;  %v1137_v33 = vadd.f32 %v2760_v38, %v2758_v34 }
 0x2a2   : > { %v2768_v35 = vpop.eup %1781  ;;  %v866_v14 = vpop.xlane.xlu1 %865 }
 0x2a3   : > { %v1049_v52 = vmul.f32 1.442695, %v929_v7  ;;  %v1051_v26 = vmul.f32 1.442695, %v930_v37  ;;  %v931_v29 = vsub.f32 %v3051_v21, %v866_v14  ;;  %v932_v3 = vsub.f32 %v3052_v4, %v866_v14  ;;  %1138 = vadd.xlane.f32.xlu0 %v1137_v33  ;;  %v3055_v21 = vld [vmem:[#allocation23_spill] sm:$0xff] }
 0x2a4   : > { %v1140_v51 = vadd.f32 %v2768_v35, %v2762_v54 }
 0x2a5   : > { %1791 = vpow2.f32 %v1049_v52  ;;  %v1053_v50 = vmul.f32 1.442695, %v931_v29  ;;  %v1055_v23 = vmul.f32 1.442695, %v932_v3 }
 0x2a6   : > { %1793 = vpow2.f32 %v1051_v26  ;;  %1141 = vadd.xlane.f32.xlu1 %v1140_v51 }
 0x2a7   : > { %v2774_v36 = vpop.eup %1783  ;;  %1795 = vpow2.f32 %v1053_v50 }
 0x2a8   : > { %3053 = vst [vmem:[#allocation16_spill] sm:$0xff] %v2774_v36  ;;  %v2776_v5 = vpop.eup %1785  ;;  %1797 = vpow2.f32 %v1055_v23  ;;  %v869_v7 = vpop.xlane.xlu0 %868 }
 0x2a9   : > { %v2778_v37 = vpop.eup %1787  ;;  %v933_v4 = vsub.f32 %v2543_v16, %v869_v7  ;;  %v934_v33 = vsub.f32 %v3055_v21, %v869_v7  ;;  %v1143_v14 = vadd.f32 %v2776_v5, %v2774_v36 }
 0x2aa   : > { %3054 = vst [vmem:[#allocation17_spill] sm:$0xff] %v2778_v37  ;;  %v2784_v52 = vpop.eup %1789 }
 0x2ab   : > { %v1057_v3 = vmul.f32 1.442695, %v933_v4  ;;  %v1059_v26 = vmul.f32 1.442695, %v934_v33  ;;  %1144 = vadd.xlane.f32.xlu0 %v1143_v14  ;;  %v1146_v29 = vadd.f32 %v2784_v52, %v2778_v37 }
 0x2ad   : > { %1799 = vpow2.f32 %v1057_v3  ;;  %1147 = vadd.xlane.f32.xlu1 %v1146_v29  ;;  %v375_v3 = vld [vmem:[%s2983_s4 + $0x8] sm:$0xff] }
 0x2ae   : > { %1801 = vpow2.f32 %v1059_v26  ;;  %v2809_v26 = vpop.f32.mrb[0].mxu0 }
 0x2af   : > { %v2788_v23 = vpop.eup %1791  ;;  %3062 = vst [vmem:[#allocation26_spill] sm:$0xff] %v2809_v26  ;;  %v2811_v29 = vpop.f32.mrb[1].mxu0 }
 0x2b0   : > { %3056 = vst [vmem:[#allocation18_spill] sm:$0xff] %v2788_v23  ;;  %v2790_v51 = vpop.eup %1793  ;;  %3063 = vst [vmem:[#allocation27_spill] sm:$0xff] %v2811_v29  ;;  %v872_v26 = vpop.xlane.xlu1 %871 }
 0x2b1   : > { %3057 = vst [vmem:[#allocation19_spill] sm:$0xff] %v2790_v51  ;;  %v2792_v16 = vpop.eup %1795  ;;  %v1149_v50 = vadd.f32 %v2790_v51, %v2788_v23  ;;  %v3068_v23 = vld [vmem:[#allocation24_spill] sm:$0xff] }
 0x2b2   : > { %3058 = vst [vmem:[#allocation20_spill] sm:$0xff] %v2792_v16  ;;  %v2796_v7 = vpop.eup %1797 }
 0x2b3   : > { %3059 = vst [vmem:[#allocation21_spill] sm:$0xff] %v2796_v7  ;;  %1150 = vadd.xlane.f32.xlu0 %v1149_v50  ;;  %v1152_v4 = vadd.f32 %v2796_v7, %v2792_v16  ;;  %v2813_v50 = vpop.f32.mrb[2].mxu0  ;;  %v936_v7 = vsub.f32 %v3068_v23, %v872_v26 }
 0x2b4   : > { %3064 = vst [vmem:[#allocation28_spill] sm:$0xff] %v2813_v50  ;;  %v2818_v16 = vpop.f32.mrb[3].mxu0  ;;  %v935_v50 = vsub.f32 %v2549_v62, %v872_v26 }
 0x2b5   : > { %1153 = vadd.xlane.f32.xlu1 %v1152_v4  ;;  %v376_v4 = vld [vmem:[%s2983_s4 + $0x10] sm:$0xff]  ;;  %3065 = vst [vmem:[#allocation29_spill] sm:$0xff] %v2818_v16  ;;  %v1063_v51 = vmul.f32 1.442695, %v936_v7 }
 0x2b7   : > { %v2800_v21 = vpop.eup %1799 }
 0x2b8   : > { %3060 = vst [vmem:[#allocation22_spill] sm:$0xff] %v2800_v21  ;;  %v2802_v33 = vpop.eup %1801 }
 0x2b9   : > { %3061 = vst [vmem:[#allocation23_spill] sm:$0xff] %v2802_v33  ;;  %v1155_v14 = vadd.f32 %v2802_v33, %v2800_v21  ;;  %v2820_v21 = vpop.f32.mrb[4].mxu0  ;;  %v374_v33 = vld [vmem:[%s2983_s4] sm:$0xff] }
 0x2ba   : > { %3066 = vst [vmem:[#allocation30_spill] sm:$0xff] %v2820_v21 }
 0x2bb   : > { %1156 = vadd.xlane.f32.xlu0 %v1155_v14  ;;  %v2822_v14 = vpop.f32.mrb[5].mxu0 }
 0x2bc   : > { %3067 = vst [vmem:[#allocation31_spill] sm:$0xff] %v2822_v14 }
 0x2c6   : > { %385 = vperm.xlu1 %1670, %v375_v3  }
 0x2ca   : > { %390 = vperm.xlu1 %1670, %v376_v4   ;;  %v1061_v4 = vmul.f32 1.442695, %v935_v50 }
 0x2d0   : > { %v1067_v29 = vpop.xlane.xlu0 %1066 }
 0x2d1   : > { %380 = vperm.xlu0 %1669, %v374_v33   ;;  %1803 = vrcp.f32 %v1067_v29 }
 0x2d3   : > { %v1070_v3 = vpop.xlane.xlu1 %1069 }
 0x2d4   : > { %1805 = vrcp.f32 %v1070_v3 }
 0x2d8   : > { %v1073_v16 = vpop.xlane.xlu0 %1072 }
 0x2d9   : > { %1807 = vrcp.f32 %v1073_v16 }
 0x2db   : > { %v1076_v21 = vpop.xlane.xlu1 %1075  ;;  %v1804_v14 = vpop.eup %1803 }
 0x2dc   : > { %1809 = vrcp.f32 %v1076_v21  ;;  %v1194_v36 = vmul.f32 %v1804_v14, %v2568_v9  ;;  %v1193_v29 = vmul.f32 %v1804_v14, %v2566_v42 }
 0x2dd   : > { %1811 = vpow2.f32 %v1061_v4 }
 0x2de   : > { %v1806_v37 = vpop.eup %1805  ;;  %1813 = vpow2.f32 %v1063_v51 }
 0x2df   : > { %v1196_v33 = vmul.f32 %v1806_v37, %v2576_v57  ;;  %v1195_v62 = vmul.f32 %v1806_v37, %v2570_v13 }
 0x2e0   : > { %v1079_v3 = vpop.xlane.xlu0 %1078 }
 0x2e1   : > { %v1258_v23 = vpack.c.bf16 %v1196_v33, %v1194_v36  ;;  %v1257_v26 = vpack.c.bf16 %v1195_v62, %v1193_v29  ;;  %1815 = vrcp.f32 %v1079_v3 }
 0x2e3   : > { %v1082_v7 = vpop.xlane.xlu1 %1081  ;;  %1301 = vmatprep.subr.bf16.mxu0 %v1258_v23  ;;  %v1808_v16 = vpop.eup %1807 }
 0x2e4   : > { %1817 = vrcp.f32 %v1082_v7  ;;  %1302 = vmatpush1.bf16.msra.mxu0 %v1257_v26  ;;  %v1198_v9 = vmul.f32 %v1808_v16, %v2584_v43  ;;  %v1197_v42 = vmul.f32 %v1808_v16, %v2582_v63 }
 0x2e6   : > { %v1810_v21 = vpop.eup %1809 }
 0x2e7   : > { %v2833_v50 = vpop.eup %1811  ;;  %v1200_v57 = vmul.f32 %v1810_v21, %v2592_v47  ;;  %v1199_v13 = vmul.f32 %v1810_v21, %v2586_v46 }
 0x2e8   : > { %v2839_v37 = vpop.eup %1813  ;;  %v1085_v36 = vpop.xlane.xlu0 %1084 }
 0x2e9   : > { %v1260_v51 = vpack.c.bf16 %v1200_v57, %v1198_v9  ;;  %v1259_v14 = vpack.c.bf16 %v1199_v13, %v1197_v42  ;;  %1819 = vrcp.f32 %v1085_v36  ;;  %v1158_v43 = vadd.f32 %v2839_v37, %v2833_v50 }
 0x2eb   : > { %v1088_v4 = vpop.xlane.xlu1 %1087  ;;  %1303 = vmatprep.subr.bf16.mxu0 %v1260_v51  ;;  %v1816_v33 = vpop.eup %1815  ;;  %v377_v51 = vld [vmem:[%s2983_s4 + $0x18] sm:$0xff] }
 0x2ec   : > { %1821 = vrcp.f32 %v1088_v4  ;;  %1304 = vmatpush1.bf16.msra.mxu0 %v1259_v14  ;;  %v1202_v63 = vmul.f32 %v1816_v33, %v2600_v39  ;;  %v1201_v47 = vmul.f32 %v1816_v33, %v2598_v10 }
 0x2ee   : > { %v1818_v29 = vpop.eup %1817  ;;  %1159 = vadd.xlane.f32.xlu1 %v1158_v43 }
 0x2ef   : > { %v1204_v46 = vmul.f32 %v1818_v29, %v2608_v61  ;;  %v1203_v62 = vmul.f32 %v1818_v29, %v2602_v19 }
 0x2f0   : > { %v1091_v3 = vpop.xlane.xlu0 %1090 }
 0x2f1   : > { %v1262_v23 = vpack.c.bf16 %v1204_v46, %v1202_v63  ;;  %v1261_v26 = vpack.c.bf16 %v1203_v62, %v1201_v47  ;;  %1823 = vrcp.f32 %v1091_v3 }
 0x2f3   : > { %v1094_v7 = vpop.xlane.xlu1 %1093  ;;  %1305 = vmatprep.subr.bf16.mxu0 %v1262_v23  ;;  %v1820_v16 = vpop.eup %1819 }
 0x2f4   : > { %1825 = vrcp.f32 %v1094_v7  ;;  %1306 = vmatpush1.bf16.msra.mxu0 %v1261_v26  ;;  %v1206_v9 = vmul.f32 %v1820_v16, %v2616_v53  ;;  %v1205_v61 = vmul.f32 %v1820_v16, %v2614_v20  ;;  %v2854_v53 = vpop.f32.mrb[6].mxu0 }
 0x2f5   : > { %v2860_v43 = vpop.f32.mrb[7].mxu0 }
 0x2f6   : > { %v1822_v21 = vpop.eup %1821 }
 0x2f7   : > { %v1208_v39 = vmul.f32 %v1822_v21, %v2624_v8  ;;  %v1207_v10 = vmul.f32 %v1822_v21, %v2618_v55 }
 0x2f8   : > { %v1097_v57 = vpop.xlane.xlu0 %1096 }
 0x2f9   : > { %v1264_v19 = vpack.c.bf16 %v1208_v39, %v1206_v9  ;;  %v1263_v42 = vpack.c.bf16 %v1207_v10, %v1205_v61  ;;  %1827 = vrcp.f32 %v1097_v57 }
 0x2fb   : > { %v1100_v13 = vpop.xlane.xlu1 %1099  ;;  %1307 = vmatprep.subr.bf16.mxu0 %v1264_v19  ;;  %v1824_v36 = vpop.eup %1823 }
 0x2fc   : > { %1829 = vrcp.f32 %v1100_v13  ;;  %1308 = vmatpush1.bf16.msra.mxu0 %v1263_v42  ;;  %v1210_v20 = vmul.f32 %v1824_v36, %v2632_v2  ;;  %v1209_v14 = vmul.f32 %v1824_v36, %v2630_v30 }
 0x2fe   : > { %v1826_v8 = vpop.eup %1825 }
 0x2ff   : > { %395 = vperm.xlu1 %1670, %v377_v51   ;;  %v1212_v55 = vmul.f32 %v1826_v8, %v2640_v18  ;;  %v1211_v4 = vmul.f32 %v1826_v8, %v2634_v45 }
 0x300   : > { %v1103_v33 = vpop.xlane.xlu0 %1102 }
 0x301   : > { %v1266_v29 = vpack.c.bf16 %v1212_v55, %v1210_v20  ;;  %v1265_v63 = vpack.c.bf16 %v1211_v4, %v1209_v14  ;;  %1831 = vrcp.f32 %v1103_v33 }
 0x303   : > { %v1106_v46 = vpop.xlane.xlu1 %1105  ;;  %1309 = vmatprep.subr.bf16.mxu0 %v1266_v29  ;;  %v1828_v47 = vpop.eup %1827 }
 0x304   : > { %1833 = vrcp.f32 %v1106_v46  ;;  %1310 = vmatpush1.bf16.msra.mxu0 %v1265_v63  ;;  %v1214_v2 = vmul.f32 %v1828_v47, %v2648_v12  ;;  %v1213_v30 = vmul.f32 %v1828_v47, %v2646_v44 }
 0x306   : > { %v1830_v62 = vpop.eup %1829 }
 0x307   : > { %v1216_v18 = vmul.f32 %v1830_v62, %v2656_v28  ;;  %v1215_v45 = vmul.f32 %v1830_v62, %v2650_v0 }
 0x308   : > { %v1109_v3 = vpop.xlane.xlu0 %1108 }
 0x309   : > { %v1268_v23 = vpack.c.bf16 %v1216_v18, %v1214_v2  ;;  %v1267_v26 = vpack.c.bf16 %v1215_v45, %v1213_v30  ;;  %1835 = vrcp.f32 %v1109_v3  ;;  %v3069_v3 = vld [vmem:[#allocation25_spill] sm:$0xff] }
 0x30b   : > { %v1112_v7 = vpop.xlane.xlu1 %1111  ;;  %1311 = vmatprep.subr.bf16.mxu0 %v1268_v23  ;;  %v1832_v16 = vpop.eup %1831 }
 0x30c   : > { %1837 = vrcp.f32 %v1112_v7  ;;  %1312 = vmatpush1.bf16.msra.mxu0 %v1267_v26  ;;  %v1218_v9 = vmul.f32 %v1832_v16, %v2664_v22  ;;  %v1217_v28 = vmul.f32 %v1832_v16, %v2662_v60 }
 0x30e   : > { %v1834_v21 = vpop.eup %1833 }
 0x30f   : > { %v1220_v12 = vmul.f32 %v1834_v21, %v2672_v40  ;;  %v1219_v44 = vmul.f32 %v1834_v21, %v2666_v49 }
 0x310   : > { %v1115_v39 = vpop.xlane.xlu0 %1114 }
 0x311   : > { %v1270_v0 = vpack.c.bf16 %v1220_v12, %v1218_v9  ;;  %v1269_v61 = vpack.c.bf16 %v1219_v44, %v1217_v28  ;;  %1839 = vrcp.f32 %v1115_v39  ;;  %v3070_v9 = vld [vmem:[#allocation13_spill] sm:$0xff]  ;;  %v3071_v28 = vld [vmem:[#allocation15_spill] sm:$0xff]  ;;  %v3072_v44 = vld [vmem:[#allocation12_spill] sm:$0xff] }
 0x312   : > { %v3073_v39 = vld [vmem:[#allocation14_spill] sm:$0xff] }
 0x313   : > { %v1118_v10 = vpop.xlane.xlu1 %1117  ;;  %1313 = vmatprep.subr.bf16.mxu0 %v1270_v0  ;;  %v1836_v57 = vpop.eup %1835 }
 0x314   : > { %1841 = vrcp.f32 %v1118_v10  ;;  %1314 = vmatpush1.bf16.msra.mxu0 %v1269_v61  ;;  %v1222_v42 = vmul.f32 %v1836_v57, %v2680_v32  ;;  %v1221_v40 = vmul.f32 %v1836_v57, %v2678_v15 }
 0x316   : > { %v1838_v19 = vpop.eup %1837 }
 0x317   : > { %v1224_v22 = vmul.f32 %v1838_v19, %v2688_v58  ;;  %v1223_v60 = vmul.f32 %v1838_v19, %v2682_v6 }
 0x318   : > { %v1121_v13 = vpop.xlane.xlu0 %1120 }
 0x319   : > { %v1272_v49 = vpack.c.bf16 %v1224_v22, %v1222_v42  ;;  %v1271_v36 = vpack.c.bf16 %v1223_v60, %v1221_v40  ;;  %1843 = vrcp.f32 %v1121_v13 }
 0x31b   : > { %v1124_v51 = vpop.xlane.xlu1 %1123  ;;  %1315 = vmatprep.subr.bf16.mxu0 %v1272_v49  ;;  %v1840_v8 = vpop.eup %1839 }
 0x31c   : > { %1845 = vrcp.f32 %v1124_v51  ;;  %1316 = vmatpush1.bf16.msra.mxu0 %v1271_v36  ;;  %v1226_v55 = vmul.f32 %v1840_v8, %v2696_v48  ;;  %v1225_v58 = vmul.f32 %v1840_v8, %v2694_v31 }
 0x31e   : > { %v1842_v20 = vpop.eup %1841 }
 0x31f   : > { %v1228_v32 = vmul.f32 %v1842_v20, %v2704_v11  ;;  %v1227_v15 = vmul.f32 %v1842_v20, %v2698_v41 }
 0x320   : > { %v1127_v14 = vpop.xlane.xlu0 %1126 }
 0x321   : > { %v1274_v6 = vpack.c.bf16 %v1228_v32, %v1226_v55  ;;  %v1273_v4 = vpack.c.bf16 %v1227_v15, %v1225_v58  ;;  %1847 = vrcp.f32 %v1127_v14  ;;  %v3074_v58 = vld [vmem:[#allocation16_spill] sm:$0xff]  ;;  %v3075_v15 = vld [vmem:[#allocation17_spill] sm:$0xff] }
 0x323   : > { %v1130_v33 = vpop.xlane.xlu1 %1129  ;;  %1317 = vmatprep.subr.bf16.mxu0 %v1274_v6  ;;  %v1844_v29 = vpop.eup %1843 }
 0x324   : > { %1849 = vrcp.f32 %v1130_v33  ;;  %1318 = vmatpush1.bf16.msra.mxu0 %v1273_v4  ;;  %v1230_v46 = vmul.f32 %v1844_v29, %v2712_v1  ;;  %v1229_v11 = vmul.f32 %v1844_v29, %v2710_v59 }
 0x326   : > { %v1846_v63 = vpop.eup %1845 }
 0x327   : > { %v1232_v48 = vmul.f32 %v1846_v63, %v2720_v27  ;;  %v1231_v31 = vmul.f32 %v1846_v63, %v2714_v56  ;;  %v3076_v63 = vld [vmem:[#allocation19_spill] sm:$0xff] }
 0x328   : > { %v1133_v47 = vpop.xlane.xlu0 %1132 }
 0x329   : > { %v1276_v41 = vpack.c.bf16 %v1232_v48, %v1230_v46  ;;  %v1275_v62 = vpack.c.bf16 %v1231_v31, %v1229_v11  ;;  %1851 = vrcp.f32 %v1133_v47  ;;  %v3077_v48 = vld [vmem:[#allocation21_spill] sm:$0xff]  ;;  %v3078_v31 = vld [vmem:[#allocation18_spill] sm:$0xff]  ;;  %v3079_v47 = vld [vmem:[#allocation20_spill] sm:$0xff] }
 0x32b   : > { %v1136_v2 = vpop.xlane.xlu1 %1135  ;;  %1319 = vmatprep.subr.bf16.mxu0 %v1276_v41  ;;  %v1848_v18 = vpop.eup %1847 }
 0x32c   : > { %1853 = vrcp.f32 %v1136_v2  ;;  %1320 = vmatpush1.bf16.msra.mxu0 %v1275_v62  ;;  %v1234_v45 = vmul.f32 %v1848_v18, %v2728_v17  ;;  %v1233_v27 = vmul.f32 %v1848_v18, %v2726_v25  ;;  %v3080_v18 = vld [vmem:[#allocation28_spill] sm:$0xff] }
 0x32e   : > { %v1850_v30 = vpop.eup %1849 }
 0x32f   : > { %v1236_v1 = vmul.f32 %v1850_v30, %v2736_v24  ;;  %v1235_v59 = vmul.f32 %v1850_v30, %v3069_v3 }
 0x330   : > { %v1139_v23 = vpop.xlane.xlu0 %1138 }
 0x331   : > { %v1278_v56 = vpack.c.bf16 %v1236_v1, %v1234_v45  ;;  %v1277_v26 = vpack.c.bf16 %v1235_v59, %v1233_v27  ;;  %1855 = vrcp.f32 %v1139_v23  ;;  %v3081_v45 = vld [vmem:[#allocation29_spill] sm:$0xff]  ;;  %v3082_v27 = vld [vmem:[#allocation26_spill] sm:$0xff]  ;;  %v3083_v59 = vld [vmem:[#allocation27_spill] sm:$0xff] }
 0x333   : > { %v1142_v7 = vpop.xlane.xlu1 %1141  ;;  %1321 = vmatprep.subr.bf16.mxu0 %v1278_v56  ;;  %v1852_v16 = vpop.eup %1851 }
 0x334   : > { %1857 = vrcp.f32 %v1142_v7  ;;  %1322 = vmatpush1.bf16.msra.mxu0 %v1277_v26  ;;  %v1238_v12 = vmul.f32 %v1852_v16, %v3070_v9  ;;  %v1237_v24 = vmul.f32 %v1852_v16, %v3072_v44  ;;  %v3084_v9 = vld [vmem:[#allocation30_spill] sm:$0xff] }
 0x336   : > { %v1854_v21 = vpop.eup %1853 }
 0x337   : > { %v1240_v17 = vmul.f32 %v1854_v21, %v3071_v28  ;;  %v1239_v25 = vmul.f32 %v1854_v21, %v3073_v39  ;;  %v3085_v28 = vld [vmem:[#allocation31_spill] sm:$0xff] }
 0x338   : > { %v1145_v0 = vpop.xlane.xlu0 %1144 }
 0x339   : > { %v1280_v61 = vpack.c.bf16 %v1240_v17, %v1238_v12  ;;  %v1279_v10 = vpack.c.bf16 %v1239_v25, %v1237_v24  ;;  %1859 = vrcp.f32 %v1145_v0 }
 0x33a   : > { %v1148_v57 = vpop.xlane.xlu1 %1147 }
 0x33b   : > { %1323 = vmatprep.subr.bf16.mxu0 %v1280_v61  ;;  %v1856_v19 = vpop.eup %1855  ;;  %1861 = vrcp.f32 %v1148_v57 }
 0x33c   : > { %1324 = vmatpush1.bf16.msra.mxu0 %v1279_v10  ;;  %v1242_v22 = vmul.f32 %v1856_v19, %v2760_v38  ;;  %v1241_v60 = vmul.f32 %v1856_v19, %v2758_v34  ;;  %v3086_v10 = vld [vmem:[#allocation23_spill] sm:$0xff] }
 0x33e   : > { %v1858_v42 = vpop.eup %1857 }
 0x33f   : > { %v1244_v40 = vmul.f32 %v1858_v42, %v2768_v35  ;;  %v1243_v13 = vmul.f32 %v1858_v42, %v2762_v54  ;;  %v3087_v42 = vld [vmem:[#allocation22_spill] sm:$0xff] }
 0x340   : > { %v1151_v49 = vpop.xlane.xlu0 %1150 }
 0x341   : > { %1863 = vrcp.f32 %v1151_v49  ;;  %v1282_v36 = vpack.c.bf16 %v1244_v40, %v1242_v22  ;;  %v1281_v51 = vpack.c.bf16 %v1243_v13, %v1241_v60 }
 0x342   : > { %v1154_v8 = vpop.xlane.xlu1 %1153 }
 0x343   : > { %1865 = vrcp.f32 %v1154_v8  ;;  %1325 = vmatprep.subr.bf16.mxu0 %v1282_v36  ;;  %v1860_v20 = vpop.eup %1859  ;;  %v1392_v8 = vld [vmem:[%s2229_s8 + $0x8] sm:$0xff] }
 0x344   : > { %1326 = vmatpush1.bf16.msra.mxu0 %v1281_v51  ;;  %v1246_v32 = vmul.f32 %v1860_v20, %v2776_v5  ;;  %v1245_v35 = vmul.f32 %v1860_v20, %v3074_v58  ;;  %v1394_v58 = vld [vmem:[%s2229_s8 + $0x18] sm:$0xff] }
 0x345   : > { %v1862_v55 = vpop.eup %1861 }
 0x346   : > { %v1248_v38 = vmul.f32 %v1862_v55, %v2784_v52  ;;  %v1247_v34 = vmul.f32 %v1862_v55, %v3075_v15  ;;  %v386_v29 = vpop.permute.xlu1 %385  ;;  %v1393_v55 = vld [vmem:[%s2229_s8 + $0x10] sm:$0xff] }
 0x347   : > { %v454_v30 = vadd.f32 %v3080_v18, %v386_v29  ;;  %v456_v1 = vadd.f32 %v3081_v45, %v386_v29 }
 0x348   : > { %v1284_v14 = vpack.c.bf16 %v1248_v38, %v1246_v32  ;;  %v1283_v54 = vpack.c.bf16 %v1247_v34, %v1245_v35  ;;  %v1157_v4 = vpop.xlane.xlu0 %1156 }
 0x349   : > { %1867 = vrcp.f32 %v1157_v4  ;;  %v1395_v4 = vld [vmem:[%s2229_s8 + $0x20] sm:$0xff] }
 0x34a   : > { %1327 = vmatprep.subr.bf16.mxu0 %v1284_v14  ;;  %v391_v7 = vpop.permute.xlu1 %390 }
 0x34b   : > { %v1864_v6 = vpop.eup %1863  ;;  %1328 = vmatpush1.bf16.msra.mxu0 %v1283_v54  ;;  %v460_v12 = vadd.f32 %v3084_v9, %v391_v7  ;;  %v462_v17 = vadd.f32 %v3085_v28, %v391_v7 }
 0x34c   : > { %v1250_v46 = vmul.f32 %v1864_v6, %v3076_v63  ;;  %v1249_v5 = vmul.f32 %v1864_v6, %v3078_v31  ;;  %v1396_v63 = vld [vmem:[%s2229_s8 + $0x28] sm:$0xff] }
 0x34d   : > { %v1866_v33 = vpop.eup %1865 }
 0x34e   : > { %v1252_v11 = vmul.f32 %v1866_v33, %v3077_v48  ;;  %v1251_v52 = vmul.f32 %v1866_v33, %v3079_v47  ;;  %v1398_v47 = vld [vmem:[%s2229_s8 + $0x38] sm:$0xff] }
 0x350   : > { %v381_v41 = vpop.permute.xlu0 %380  ;;  %v1286_v62 = vpack.c.bf16 %v1252_v11, %v1250_v46  ;;  %v1285_v2 = vpack.c.bf16 %v1251_v52, %v1249_v5  ;;  %v1397_v11 = vld [vmem:[%s2229_s8 + $0x30] sm:$0xff] }
 0x351   : > { %v450_v3 = vadd.f32 %v3082_v27, %v381_v41  ;;  %v452_v23 = vadd.f32 %v3083_v59, %v381_v41 }
 0x352   : > { %1329 = vmatprep.subr.bf16.mxu0 %v1286_v62 }
 0x353   : > { %v1297_v56 = vpack.c.bf16 %v454_v30, %v450_v3  ;;  %v1298_v26 = vpack.c.bf16 %v456_v1, %v452_v23  ;;  %1330 = vmatpush1.bf16.msra.mxu0 %v1285_v2  ;;  %v1868_v0 = vpop.eup %1867 }
 0x354   : > { %v1254_v57 = vmul.f32 %v1868_v0, %v3086_v10  ;;  %v1253_v22 = vmul.f32 %v1868_v0, %v3087_v42 }
 0x355   : > { %1333 = vmatprep.mubr.bf16.mxu0 %v1298_v26 }
 0x37b   : > { %v1160_v16 = vpop.xlane.xlu1 %1159 }
 0x37c   : > { %1869 = vrcp.f32 %v1160_v16 }
 0x37f   : > { %v396_v21 = vpop.permute.xlu1 %395 }
 0x380   : > { %v464_v44 = vadd.f32 %v2854_v53, %v396_v21  ;;  %v466_v24 = vadd.f32 %v2860_v43, %v396_v21  ;;  %v1382_v43 = vstv %s1373_s18 }
 0x382   : > { %v1299_v39 = vpack.c.bf16 %v464_v44, %v460_v12  ;;  %v1300_v25 = vpack.c.bf16 %v466_v24, %v462_v17 }
 0x386   : > { %v1870_v61 = vpop.eup %1869 }
 0x387   : > { %v1256_v19 = vmul.f32 %v1870_v61, %v2839_v37  ;;  %v1255_v40 = vmul.f32 %v1870_v61, %v2833_v50  ;;  %v1391_v37 = vld [vmem:[%s2229_s8] sm:$0xff]  ;;  %s1931_s8 = scalar_lea.vmem %s2930_s15, 1024 }
 0x388   : > { %p1932_p3 = scmp.ne.s32.totalorder %s2930_s15, %s1931_s8  ;;  %p1939_p12 = scmp.lt.s32.totalorder %s1937_s22, %s1931_s8 }
 0x389   : > { %v1288_v60 = vpack.c.bf16 %v1256_v19, %v1254_v57  ;;  %v1287_v13 = vpack.c.bf16 %v1255_v40, %v1253_v22 }
 0x38a   : > { %p1933_p13 = pnand %p1932_p3, %p3088_p11  ;;  %p1940_p9 = por %p1939_p12, %p1938_p10 }
 0x38b   : > { %1331 = vmatprep.subr.bf16.mxu0 %v1288_v60 }
 0x38c   : > { %1332 = vmatpush1.bf16.msra.mxu0 %v1287_v13  ;;  %p1934_p7 = pneg %p1933_p13 }
 0x38e   : > { %p1941_p1 = pnand %p1940_p9, %p1934_p7 }
 0x38f   : > { %1334 = vmatmul.mubr.bf16.vlgmr.msra.gmra.mrb[8].mxu0 %v1297_v56 }
 0x390   : > { %1343 = vmatprep.mubr.bf16.mxu0 %v1300_v25 }
 0x397   : > { %1344 = vmatmul.mubr.bf16.gmra.mrb[12].mxu0 %v1299_v39 }
 0x462   : > { %v1335_v53 = vpop.f32.mrb[8].mxu0 }
 0x463   : > { %v1337_v49 = vpop.f32.mrb[9].mxu0  ;;  %v1383_v51 = vmul.f32 %v1382_v43, %v1335_v53 }
 0x464   : > { %v1339_v36 = vpop.f32.mrb[10].mxu0  ;;  %v1384_v50 = vmul.f32 %v1382_v43, %v1337_v49 }
 0x465   : > { %v1341_v20 = vpop.f32.mrb[11].mxu0  ;;  %v1399_v32 = vadd.f32 %v1391_v37, %v1383_v51  ;;  %v1385_v38 = vmul.f32 %v1382_v43, %v1339_v36 }
 0x466   : > { %v1400_v35 = vadd.f32 %v1392_v8, %v1384_v50  ;;  %v1386_v15 = vmul.f32 %v1382_v43, %v1341_v20 }
 0x467   : > { %1407 = vst [vmem:[%s335_s7] sm:$0xff] %v1399_v32  ;;  %v1401_v34 = vadd.f32 %v1393_v55, %v1385_v38 }
 0x468   : > { %1408 = vst [vmem:[%s335_s7 + $0x8] sm:$0xff] %v1400_v35  ;;  %v1402_v14 = vadd.f32 %v1394_v58, %v1386_v15 }
 0x469   : > { %1409 = vst [vmem:[%s335_s7 + $0x10] sm:$0xff] %v1401_v34 }
 0x46a   : > { %v1345_v54 = vpop.f32.mrb[12].mxu0  ;;  %1410 = vst [vmem:[%s335_s7 + $0x18] sm:$0xff] %v1402_v14 }
 0x46b   : > { %v1347_v6 = vpop.f32.mrb[13].mxu0  ;;  %v1387_v29 = vmul.f32 %v1382_v43, %v1345_v54 }
 0x46c   : > { %v1349_v33 = vpop.f32.mrb[14].mxu0  ;;  %v1388_v48 = vmul.f32 %v1382_v43, %v1347_v6 }
 0x46d   : > { %v1351_v46 = vpop.f32.mrb[15].mxu0  ;;  %v1403_v31 = vadd.f32 %v1395_v4, %v1387_v29  ;;  %v1389_v5 = vmul.f32 %v1382_v43, %v1349_v33 }
 0x46e   : > { %v1404_v52 = vadd.f32 %v1396_v63, %v1388_v48  ;;  %v1390_v41 = vmul.f32 %v1382_v43, %v1351_v46 }
 0x46f   : > { %1411 = vst [vmem:[%s335_s7 + $0x20] sm:$0xff] %v1403_v31  ;;  %v1405_v62 = vadd.f32 %v1397_v11, %v1389_v5 }
 0x470   : > { %1412 = vst [vmem:[%s335_s7 + $0x28] sm:$0xff] %v1404_v52  ;;  %v1406_v2 = vadd.f32 %v1398_v47, %v1390_v41 }
 0x471   : > { %1413 = vst [vmem:[%s335_s7 + $0x30] sm:$0xff] %v1405_v62 }
 0x472   : > { %1414 = vst [vmem:[%s335_s7 + $0x38] sm:$0xff] %v1406_v2 }
 0x473   : > { %1944 = shalt.err (!%p1941_p1)
}
 0x474   : > { %s1945_s10 = scalar_lea.hbm %s2928_s17, 1024  ;;  %s1949_s19 = scalar_lea.hbm %s2985_s6, 2048 }
 0x475   : > { %p1946_p6 = scmp.ne.s32.totalorder %s2928_s17, %s1945_s10  ;;  %p1950_p4 = scmp.lt.u32.totalorder %s2928_s17, %s2985_s6 }
 0x476   : > { %p1951_p8 = scmp.lt.u32.totalorder %s1949_s19, %s1945_s10  ;;  %p1953_p3 = scmp.lt.u32.totalorder %s1945_s10, %s2928_s17 }
 0x477   : > { %p1947_p2 = pnand %p1946_p6, %p3088_p11 }
 0x478   : > { %p1952_p0 = por %p1951_p8, %p1950_p4 }
 0x479   : > { %p1948_p5 = pneg %p1947_p2 }
 0x47a   : > { %p1954_p13 = por %p1953_p3, %p1952_p0 }
 0x47c   : > { %p1955_p7 = pnand %p1954_p13, %p1948_p5 }
 0x47e   : > { %1958 = shalt.err (!%p1955_p7)
}
 0x47f   : > { %s2027_s5 = smov 256   ;;  %s2028_s21 = smov 16  }
 0x480   : > { %1598 = dma.vmem_to_hbm [thread:$0]  (%p3088_p11), %s2930_s15, 1024, %s2928_s17, %s1416_s26, %s2027_s5, %s2027_s5, %s2028_s21  }
 0x481 PF: > { %s1444_s29 = sand.u32 1, %s1997_s23   ;;  %p3089_p10 = scmp.ne.s32.totalorder %s3018_s13, 0 }
 0x482   : > { %p3090_p12 = scmp.ge.s32.totalorder %s2017_s28, 2  ;;  %s1445_s8 = scalar_lea.sflag [#allocation5], %s1444_s29 }
 0x484   : > { %p1608_p9 = pnand %p3090_p12, %p3089_p10 }
 0x486   : > { %1992 = dma.done.wait (!%p1608_p9), %s1445_s8, 1024  }
 0x487   : > { %1994 = vsyncadd (!%p1608_p9), %s1445_s8, 4294966272  ;;  %s26_s28 = sadd.s32 1, %s2017_s28   ;;  %s3091_s23 = smov %s2001_s24 }
 0x488   : > { %p23_p1 = scmp.ge.s32.totalorder %s26_s28, 4   ;;  %s3092_s24 = smov %s2005_s25 }
 0x489   : > { %s3093_s25 = smov %s2123_s12  ;;  %s3094_s26 = smov %s2013_s27 }
 0x48a   : > { %s3095_s27 = smov %s3097_s30  ;;  %25 = sbr.rel (!%p23_p1) target bundleno = 11 (0xb), region = 114 }
 0x491   :  { %1450 = vsyncpa [#allocation4], 1 }
 0x492   :  { %1452 = vsyncpa [#allocation4 + $0x1], 1 }
 0x493   :  { %1453 = vsyncpa [#allocation7], 1 }
 0x494   :  { %1455 = vsyncpa [#allocation7 + $0x1], 1 }
 0x495   :  { %1456 = vsyncpa [#allocation5], 1 }
 0x496   :  { %1458 = vsyncpa [#allocation5 + $0x1], 1 }

</bundles_post_ra>
